<compile_context>
chip_gen: v5e
topology: v5e:2x2
jax: 0.10.0
libtpu: 0.0.40
codegen_flags: <defaults>
</compile_context>

<pallas_src>
import functools

import jax
import jax.numpy as jnp
from jax.experimental import pallas as pl
from jax.experimental.pallas import tpu as pltpu


# -----------------------------------------------------------------------------
# VMEM budget / tile selection helpers
# -----------------------------------------------------------------------------
def _vmem_budget_bytes():
    """~75% of physical VMEM (96 MiB on 128 MiB parts, 48 MiB on v7x's 64 MiB);
    conservative 64 MiB assumption if the query is unavailable."""
    cap = 64 * 1024 * 1024
    try:
        info = pltpu.get_tpu_info()
        cap = int(getattr(info, "vmem_capacity_bytes", cap))
    except Exception:
        pass
    return max((cap * 3) // 4, 32 * 1024 * 1024)


def _choose_hw_tile(hw, per_col_bytes, stream_budget_bytes, max_hw_tile=None):
    """Largest lane-dense (multiple-of-128) HW tile whose pipelined
    (double-buffered) blocks fit in `stream_budget_bytes`.  The last tile may
    be ragged; raggedness is handled in-kernel (masking) / by Pallas (dropped
    out-of-bounds boundary writes).  Returns (tile, num_tiles)."""
    t = stream_budget_bytes // max(per_col_bytes, 1)
    if max_hw_tile is not None:
        t = min(t, max_hw_tile)
    t = max((t // 128) * 128, 128)
    if t >= hw:
        return hw, 1          # full extent: always layout-legal, no padding
    return t, -(-hw // t)


# -----------------------------------------------------------------------------
# Fused single-pass kernel.
# grid = (B, NT); the HW axis MUST stay the innermost "arbitrary" axis --
# feat_ref / sum_ref carry per-batch state across it and are reset at t == 0.
# -----------------------------------------------------------------------------
def _ffm_fused_kernel(fsp_ref, fcp_ref, w1_ref, b1_ref, w2_ref, b2_ref,
                      out_ref, feat_ref, sum_ref, *, hw, thw, inv_hw):
    t = pl.program_id(1)

    @pl.when(t == 0)
    def _():
        sum_ref[...] = jnp.zeros_like(sum_ref)

    # fused add (f32) -> bf16 matmul operand; 1x1 conv == (Cout,Cin)@(Cin,THW)
    x = (fsp_ref[...] + fcp_ref[...]).astype(jnp.bfloat16)
    feat = jnp.dot(w1_ref[...], x, preferred_element_type=jnp.float32)
    feat = jnp.maximum(feat + b1_ref[...], 0.0)        # BN1 scale folded into w1

    if hw % thw != 0:
        # ragged last tile: zero the padded columns so they don't pollute the
        # channel mean (their values in the padded input block are unspecified)
        col = jax.lax.broadcasted_iota(jnp.int32, feat.shape, 1)
        feat = jnp.where(col < (hw - t * thw), feat, 0.0)

    sum_ref[...] += jnp.sum(feat, axis=-1, keepdims=True)

    start = t * thw
    if thw % 128 == 0:
        start = pl.multiple_of(start, 128)
    feat_ref[:, pl.ds(start, thw)] = feat.astype(feat_ref.dtype)

    @pl.when(t == pl.num_programs(1) - 1)
    def _():
        mean = sum_ref[...] * inv_hw                                 # (Cout, 1)
        att = jnp.dot(w2_ref[...], mean, preferred_element_type=jnp.float32)
        att = jax.nn.sigmoid(att + b2_ref[...]) + 1.0   # feat*att + feat fused
        out_ref[...] = (feat_ref[:, :hw].astype(jnp.float32) * att
                        ).astype(out_ref.dtype)


# -----------------------------------------------------------------------------
# Fallback pass A: stream feat (bf16) to HBM + per-batch channel sums.
# grid = (B, NT); HW axis "arbitrary" (sum_ref is a resident output block).
# -----------------------------------------------------------------------------
def _ffm_feat_kernel(fsp_ref, fcp_ref, w1_ref, b1_ref, feat_ref, sum_ref,
                     *, hw, thw):
    t = pl.program_id(1)

    @pl.when(t == 0)
    def _():
        sum_ref[...] = jnp.zeros_like(sum_ref)

    x = (fsp_ref[...] + fcp_ref[...]).astype(jnp.bfloat16)
    feat = jnp.dot(w1_ref[...], x, preferred_element_type=jnp.float32)
    feat = jnp.maximum(feat + b1_ref[...], 0.0)
    feat_ref[...] = feat.astype(feat_ref.dtype)   # OOB part of last tile dropped

    if hw % thw != 0:
        col = jax.lax.broadcasted_iota(jnp.int32, feat.shape, 1)
        feat = jnp.where(col < (hw - t * thw), feat, 0.0)
    sum_ref[...] += jnp.sum(feat, axis=-1, keepdims=True)


# -----------------------------------------------------------------------------
# Fallback pass B: pure elementwise stream out = feat * (att + 1).
# grid = (B, NT), both axes independent ("parallel", megacore friendly).
# -----------------------------------------------------------------------------
def _ffm_scale_kernel(feat_ref, att_ref, out_ref):
    out_ref[...] = (feat_ref[...].astype(jnp.float32) * att_ref[...]
                    ).astype(out_ref.dtype)


# -----------------------------------------------------------------------------
# Wrapper
# -----------------------------------------------------------------------------
def feature_fusion_forward(fsp, fcp, w1, scale1, bias1, w2, scale2, bias2,
                           *, out_dtype=jnp.bfloat16, force_path=None,
                           max_hw_tile=None):
    """fsp, fcp: NCHW (B, Cin, H, W) float32; w1: (Cout, Cin); w2: (Cout, Cout);
    scale*/bias*: eval-mode BatchNorm folded to per-channel scale/bias.
    Returns NCHW (B, Cout, H, W) in `out_dtype` (bf16 by default to halve the
    HBM writeback).  `force_path` in {None, "fused", "materialize"}."""
    B, Cin, H, W = fsp.shape
    Cout = w1.shape[0]
    HW = H * W
    in_bytes = jnp.dtype(fsp.dtype).itemsize
    out_bytes = jnp.dtype(out_dtype).itemsize

    # NCHW -> (B, C, HW): free reshape, HW stays on the lane axis.  No dtype
    # cast here (a materialized cast would be an extra HBM pass).
    fsp_f = fsp.reshape(B, Cin, HW)
    fcp_f = fcp.reshape(B, Cin, HW)

    # Fold eval-mode BN scales into the bias-free 1x1 conv weights.
    w1_f = (w1 * scale1[:, None]).astype(jnp.bfloat16)        # (Cout, Cin)
    b1 = bias1.reshape(Cout, 1).astype(jnp.float32)
    w2_f = (w2 * scale2[:, None]).astype(jnp.float32)         # (Cout, Cout) tiny
    b2 = bias2.reshape(Cout, 1).astype(jnp.float32)

    budget = _vmem_budget_bytes()
    stream_budget = budget // 2

    w1_spec = pl.BlockSpec((Cout, Cin), lambda b, t: (0, 0))
    w2_spec = pl.BlockSpec((Cout, Cout), lambda b, t: (0, 0))
    col_spec = pl.BlockSpec((Cout, 1), lambda b, t: (0, 0))

    # ---------------- fused single pass (feat resident in VMEM) -------------
    per_col_fused = 2 * 2 * Cin * in_bytes          # 2 inputs x double buffer
    thw_f, nt_f = _choose_hw_tile(HW, per_col_fused, stream_budget, max_hw_tile)
    weight_bytes = 2 * (Cout * Cin * 2 + Cout * Cout * 4 + 2 * Cout * 4)
    resident = (Cout * nt_f * thw_f * 2           # bf16 feat scratch
                + 2 * Cout * HW * out_bytes       # resident output block (x2)
                + Cout * 4)                       # channel-sum scratch
    fused_fits = (per_col_fused * thw_f + weight_bytes + resident) <= budget
    use_fused = (force_path == "fused") or (force_path is None and fused_fits)

    if use_fused:
        x_spec = pl.BlockSpec((pl.Squeezed(), Cin, thw_f), lambda b, t: (b, 0, t))
        out_flat = pl.pallas_call(
            functools.partial(_ffm_fused_kernel, hw=HW, thw=thw_f, inv_hw=1.0 / HW),
            out_shape=jax.ShapeDtypeStruct((B, Cout, HW), out_dtype),
            grid_spec=pltpu.PrefetchScalarGridSpec(
                num_scalar_prefetch=0,
                grid=(B, nt_f),
                in_specs=[x_spec, x_spec, w1_spec, col_spec, w2_spec, col_spec],
                out_specs=pl.BlockSpec((pl.Squeezed(), Cout, HW),
                                       lambda b, t: (b, 0, 0)),
                scratch_shapes=[pltpu.VMEM((Cout, nt_f * thw_f), jnp.bfloat16),
                                pltpu.VMEM((Cout, 1), jnp.float32)]),
            compiler_params=pltpu.CompilerParams(
                dimension_semantics=("parallel", "arbitrary"),
                vmem_limit_bytes=budget),
        )(fsp_f, fcp_f, w1_f, b1, w2_f, b2)
        return out_flat.reshape(B, Cout, H, W)

    # -------- fallback: materialize feat (bf16), finalize att in JAX, scale --
    per_col_a = 2 * 2 * Cin * in_bytes + 2 * Cout * 2
    thw_a, nt_a = _choose_hw_tile(HW, per_col_a, stream_budget, max_hw_tile)
    x_spec_a = pl.BlockSpec((pl.Squeezed(), Cin, thw_a), lambda b, t: (b, 0, t))
    feat_bf, sums = pl.pallas_call(
        functools.partial(_ffm_feat_kernel, hw=HW, thw=thw_a),
        out_shape=(jax.ShapeDtypeStruct((B, Cout, HW), jnp.bfloat16),
                   jax.ShapeDtypeStruct((B, Cout, 1), jnp.float32)),
        grid_spec=pltpu.PrefetchScalarGridSpec(
            num_scalar_prefetch=0,
            grid=(B, nt_a),
            in_specs=[x_spec_a, x_spec_a, w1_spec, col_spec],
            out_specs=[pl.BlockSpec((pl.Squeezed(), Cout, thw_a),
                                    lambda b, t: (b, 0, t)),
                       pl.BlockSpec((pl.Squeezed(), Cout, 1),
                                    lambda b, t: (b, 0, 0))]),
        compiler_params=pltpu.CompilerParams(
            dimension_semantics=("parallel", "arbitrary"),
            vmem_limit_bytes=budget),
    )(fsp_f, fcp_f, w1_f, b1)

    # tiny attention finalize (B x Cout work): plain JAX, megacore-neutral
    mean = sums[:, :, 0] * (1.0 / HW)                                # (B, Cout)
    att = jax.nn.sigmoid(mean @ w2_f.T
                         + bias2.astype(jnp.float32).reshape(1, Cout)) + 1.0
    att = att[:, :, None].astype(jnp.float32)                        # (B, Cout, 1)

    per_col_b = 2 * Cout * 2 + 2 * Cout * out_bytes
    thw_b, nt_b = _choose_hw_tile(HW, per_col_b, stream_budget, max_hw_tile)
    f_spec = pl.BlockSpec((pl.Squeezed(), Cout, thw_b), lambda b, t: (b, 0, t))
    out_flat = pl.pallas_call(
        _ffm_scale_kernel,
        out_shape=jax.ShapeDtypeStruct((B, Cout, HW), out_dtype),
        grid_spec=pltpu.PrefetchScalarGridSpec(
            num_scalar_prefetch=0,
            grid=(B, nt_b),
            in_specs=[f_spec,
                      pl.BlockSpec((pl.Squeezed(), Cout, 1),
                                   lambda b, t: (b, 0, 0))],
            out_specs=f_spec),
        compiler_params=pltpu.CompilerParams(
            dimension_semantics=("parallel", "parallel"),
            vmem_limit_bytes=budget),
    )(feat_bf, att)

    return out_flat.reshape(B, Cout, H, W)


# -----------------------------------------------------------------------------
# Plain-JAX f32 reference (NCHW semantics) for correctness checking.
# -----------------------------------------------------------------------------
def reference_forward(fsp, fcp, w1, scale1, bias1, w2, scale2, bias2):
    fcat = fsp + fcp
    feat = jnp.einsum('oi,bihw->bohw', w1, fcat)
    feat = feat * scale1[None, :, None, None] + bias1[None, :, None, None]
    feat = jnp.maximum(feat, 0.0)
    atten = jnp.mean(feat, axis=(2, 3), keepdims=True)
    atten = jnp.einsum('oi,bihw->bohw', w2, atten)
    atten = atten * scale2[None, :, None, None] + bias2[None, :, None, None]
    atten = jax.nn.sigmoid(atten)
    return feat * atten + feat


if __name__ == "__main__":
    eps = 1e-5
    B, Cin, Cout = 2, 64, 32

    key = jax.random.PRNGKey(0)
    k = jax.random.split(key, 8)

    # conv weights in PyTorch (Cout, Cin) layout (1x1 kernel dims squeezed),
    # kaiming_normal_(a=1): gain = 1, std = 1/sqrt(fan_in)
    w1 = jax.random.normal(k[2], (Cout, Cin), dtype=jnp.float32) / jnp.sqrt(Cin)
    w2 = jax.random.normal(k[3], (Cout, Cout), dtype=jnp.float32) / jnp.sqrt(Cout)

    # eval-mode BatchNorm params (running stats), deterministic & non-trivial
    gamma1 = 1.0 + 0.1 * jax.random.normal(k[4], (Cout,), dtype=jnp.float32)
    beta1 = 0.1 * jax.random.normal(k[5], (Cout,), dtype=jnp.float32)
    rmean1 = 0.05 * jax.random.normal(k[6], (Cout,), dtype=jnp.float32)
    rvar1 = 1.0 + 0.1 * jnp.abs(jax.random.normal(k[7], (Cout,), dtype=jnp.float32))
    gamma2 = jnp.ones((Cout,), jnp.float32)
    beta2 = jnp.zeros((Cout,), jnp.float32)
    rmean2 = jnp.zeros((Cout,), jnp.float32)
    rvar2 = jnp.ones((Cout,), jnp.float32)

    # fold BN into per-channel scale/bias
    scale1 = gamma1 / jnp.sqrt(rvar1 + eps)
    bias1 = beta1 - rmean1 * scale1
    scale2 = gamma2 / jnp.sqrt(rvar2 + eps)
    bias2 = beta2 - rmean2 * scale2
    params = (w1, scale1, bias1, w2, scale2, bias2)

    # Exercise: auto (fused, single tile), fused multi-tile, fused ragged,
    # materialize multi-tile, materialize ragged.
    cases = [
        (32, 32, None,          None),
        (32, 32, "fused",       256),
        (30, 30, "fused",       256),
        (32, 32, "materialize", 256),
        (30, 30, "materialize", 256),
    ]
    for (H, W, path, tile) in cases:
        khw = jax.random.fold_in(jax.random.PRNGKey(0), H * 1000 + W)
        ka, kb = jax.random.split(khw)
        fsp = jax.random.normal(ka, (B, Cin, H, W), dtype=jnp.float32)
        fcp = jax.random.normal(kb, (B, Cin, H, W), dtype=jnp.float32)

        out = feature_fusion_forward(fsp, fcp, *params,
                                     force_path=path, max_hw_tile=tile)
        out = jax.block_until_ready(out)

        ref = reference_forward(fsp, fcp, *params)
        assert out.shape == (B, Cout, H, W)
        out_f32 = out.astype(jnp.float32)
        err = float(jnp.max(jnp.abs(out_f32 - ref)))
        # bf16 weights/activations/output with f32 accumulation: a few % slack
        assert jnp.allclose(out_f32, ref, atol=5e-2, rtol=5e-2), (
            f"mismatch vs reference (H={H}, W={W}, path={path}): max abs err {err}")

    print("KERNEL_OK")
</pallas_src>

<mosaic_0001>
module attributes {stable_mosaic.version = 11 : i64} {
  func.func @_ffm_fused_kernel(%arg0: i32, %arg1: i32, %arg2: memref<1x64x1024xf32, #tpu.memory_space<vmem>>, %arg3: memref<1x64x1024xf32, #tpu.memory_space<vmem>>, %arg4: memref<32x64xbf16, #tpu.memory_space<vmem>>, %arg5: memref<32x1xf32, #tpu.memory_space<vmem>>, %arg6: memref<32x32xf32, #tpu.memory_space<vmem>>, %arg7: memref<32x1xf32, #tpu.memory_space<vmem>>, %arg8: memref<1x32x1024xbf16, #tpu.memory_space<vmem>>, %arg9: memref<32x1024xbf16, #tpu.memory_space<vmem>>, %arg10: memref<32x1xf32, #tpu.memory_space<vmem>>) attributes {dimension_semantics = [#tpu.dimension_semantics<parallel>, #tpu.dimension_semantics<arbitrary>], iteration_bounds = array<i64: 2, 1>, scalar_prefetch = 0 : i64, scratch_operands = 2 : i64, tpu.core_type = #tpu.core_type<tc>, window_params = [{transform_indices = @transform_0, window_bounds = array<i64: 1, 64, 1024>}, {transform_indices = @transform_1, window_bounds = array<i64: 1, 64, 1024>}, {pipeline_mode = #tpu.pipeline_mode<synchronous>, transform_indices = @transform_2, window_bounds = array<i64: 32, 64>}, {pipeline_mode = #tpu.pipeline_mode<synchronous>, transform_indices = @transform_3, window_bounds = array<i64: 32, 1>}, {pipeline_mode = #tpu.pipeline_mode<synchronous>, transform_indices = @transform_4, window_bounds = array<i64: 32, 32>}, {pipeline_mode = #tpu.pipeline_mode<synchronous>, transform_indices = @transform_5, window_bounds = array<i64: 32, 1>}, {transform_indices = @transform_6, window_bounds = array<i64: 1, 32, 1024>}]} {
    %c0_i32 = arith.constant 0 : i32
    %0 = arith.cmpi eq, %arg1, %c0_i32 : i32
    %1 = arith.extui %0 : i1 to i32
    %c0_i32_0 = arith.constant 0 : i32
    %2 = arith.cmpi ne, %1, %c0_i32_0 : i32
    scf.if %2 {
      %cst_19 = arith.constant 0.000000e+00 : f32
      %29 = vector.broadcast %cst_19 : f32 to vector<32x1xf32>
      %c0_20 = arith.constant 0 : index
      %c0_21 = arith.constant 0 : index
      %30 = vector.load %arg10[%c0_20, %c0_21] : memref<32x1xf32, #tpu.memory_space<vmem>>, vector<32x1xf32>
      tpu.vector_store %arg10[%c0_20, %c0_21], %29 {strides = array<i32>} : memref<32x1xf32, #tpu.memory_space<vmem>>, vector<32x1xf32>,
    } else {
    }
    %c0 = arith.constant 0 : index
    %c0_1 = arith.constant 0 : index
    %c0_2 = arith.constant 0 : index
    %3 = vector.load %arg2[%c0, %c0_1, %c0_2] : memref<1x64x1024xf32, #tpu.memory_space<vmem>>, vector<1x64x1024xf32>
    %4 = vector.shape_cast %3 : vector<1x64x1024xf32> to vector<64x1024xf32>
    %c0_3 = arith.constant 0 : index
    %c0_4 = arith.constant 0 : index
    %c0_5 = arith.constant 0 : index
    %5 = vector.load %arg3[%c0_3, %c0_4, %c0_5] : memref<1x64x1024xf32, #tpu.memory_space<vmem>>, vector<1x64x1024xf32>
    %6 = vector.shape_cast %5 : vector<1x64x1024xf32> to vector<64x1024xf32>
    %7 = arith.addf %4, %6 : vector<64x1024xf32>
    %8 = arith.truncf %7 : vector<64x1024xf32> to vector<64x1024xbf16>
    %c0_6 = arith.constant 0 : index
    %c0_7 = arith.constant 0 : index
    %9 = vector.load %arg4[%c0_6, %c0_7] : memref<32x64xbf16, #tpu.memory_space<vmem>>, vector<32x64xbf16>
    %cst = arith.constant dense<0.000000e+00> : vector<32x1024xf32>
    %10 = tpu.matmul %9, %8, %cst {dimension_numbers = #tpu.dot_dimension_numbers<[1], [0], [0], [1], [0, 0, 1, 1], [], []>} : vector<32x64xbf16>, vector<64x1024xbf16>, vector<32x1024xf32> -> vector<32x1024xf32>
    %c0_8 = arith.constant 0 : index
    %c0_9 = arith.constant 0 : index
    %11 = vector.load %arg5[%c0_8, %c0_9] : memref<32x1xf32, #tpu.memory_space<vmem>>, vector<32x1xf32>
    %12 = vector.broadcast %11 : vector<32x1xf32> to vector<32x1024xf32>
    %13 = arith.addf %10, %12 : vector<32x1024xf32>
    %cst_10 = arith.constant 0.000000e+00 : f32
    %14 = vector.broadcast %cst_10 : f32 to vector<32x1024xf32>
    %15 = arith.maximumf %13, %14 : vector<32x1024xf32>
    %c0_11 = arith.constant 0 : index
    %c0_12 = arith.constant 0 : index
    %16 = vector.load %arg10[%c0_11, %c0_12] : memref<32x1xf32, #tpu.memory_space<vmem>>, vector<32x1xf32>
    %cst_13 = arith.constant dense<0.000000e+00> : vector<32xf32>
    %17 = vector.multi_reduction <add>, %15, %cst_13 [1] : vector<32x1024xf32> to vector<32xf32>
    %18 = vector.shape_cast %17 : vector<32xf32> to vector<32x1xf32>
    %19 = arith.addf %16, %18 : vector<32x1xf32>
    %c0_14 = arith.constant 0 : index
    %c0_15 = arith.constant 0 : index
    %20 = vector.load %arg10[%c0_14, %c0_15] : memref<32x1xf32, #tpu.memory_space<vmem>>, vector<32x1xf32>
    tpu.vector_store %arg10[%c0_14, %c0_15], %19 {strides = array<i32>} : memref<32x1xf32, #tpu.memory_space<vmem>>, vector<32x1xf32>,
    %c1024_i32 = arith.constant 1024 : i32
    %21 = arith.muli %arg1, %c1024_i32 : i32
    %22 = tpu.assume_multiple %21, 128 : i32
    %23 = arith.truncf %15 : vector<32x1024xf32> to vector<32x1024xbf16>
    %c0_16 = arith.constant 0 : index
    %24 = arith.index_cast %22 : i32 to index
    %25 = vector.load %arg9[%c0_16, %24] : memref<32x1024xbf16, #tpu.memory_space<vmem>>, vector<32x1024xbf16>
    tpu.vector_store %arg9[%c0_16, %24], %23 {strides = array<i32>} : memref<32x1024xbf16, #tpu.memory_space<vmem>>, vector<32x1024xbf16>,
    %c0_i32_17 = arith.constant 0 : i32
    %26 = arith.cmpi eq, %arg1, %c0_i32_17 : i32
    %27 = arith.extui %26 : i1 to i32
    %c0_i32_18 = arith.constant 0 : i32
    %28 = arith.cmpi ne, %27, %c0_i32_18 : i32
    scf.if %28 {
      %c0_19 = arith.constant 0 : index
      %c0_20 = arith.constant 0 : index
      %29 = vector.load %arg10[%c0_19, %c0_20] : memref<32x1xf32, #tpu.memory_space<vmem>>, vector<32x1xf32>
      %cst_21 = arith.constant 9.765625E-4 : f32
      %30 = vector.broadcast %cst_21 : f32 to vector<32x1xf32>
      %31 = arith.mulf %29, %30 : vector<32x1xf32>
      %c0_22 = arith.constant 0 : index
      %c0_23 = arith.constant 0 : index
      %32 = vector.load %arg6[%c0_22, %c0_23] : memref<32x32xf32, #tpu.memory_space<vmem>>, vector<32x32xf32>
      %cst_24 = arith.constant dense<0.000000e+00> : vector<32x1xf32>
      %33 = tpu.matmul %32, %31, %cst_24 {dimension_numbers = #tpu.dot_dimension_numbers<[1], [0], [0], [1], [0, 0, 1, 1], [], []>} : vector<32x32xf32>, vector<32x1xf32>, vector<32x1xf32> -> vector<32x1xf32>
      %c0_25 = arith.constant 0 : index
      %c0_26 = arith.constant 0 : index
      %34 = vector.load %arg7[%c0_25, %c0_26] : memref<32x1xf32, #tpu.memory_space<vmem>>, vector<32x1xf32>
      %35 = arith.addf %33, %34 : vector<32x1xf32>
      %36 = arith.negf %35 : vector<32x1xf32>
      %37 = math.exp %36 : vector<32x1xf32>
      %cst_27 = arith.constant 1.000000e+00 : f32
      %38 = vector.broadcast %cst_27 : f32 to vector<32x1xf32>
      %39 = arith.addf %38, %37 : vector<32x1xf32>
      %40 = arith.divf %38, %39 : vector<32x1xf32>
      %cst_28 = arith.constant 1.000000e+00 : f32
      %41 = vector.broadcast %cst_28 : f32 to vector<32x1xf32>
      %42 = arith.addf %40, %41 : vector<32x1xf32>
      %c0_29 = arith.constant 0 : index
      %c0_30 = arith.constant 0 : index
      %43 = vector.load %arg9[%c0_29, %c0_30] : memref<32x1024xbf16, #tpu.memory_space<vmem>>, vector<32x1024xbf16>
      %44 = arith.extf %43 : vector<32x1024xbf16> to vector<32x1024xf32>
      %45 = vector.broadcast %42 : vector<32x1xf32> to vector<32x1024xf32>
      %46 = arith.mulf %44, %45 : vector<32x1024xf32>
      %47 = arith.truncf %46 : vector<32x1024xf32> to vector<32x1024xbf16>
      %c0_31 = arith.constant 0 : index
      %c0_32 = arith.constant 0 : index
      %c0_33 = arith.constant 0 : index
      %48 = vector.load %arg8[%c0_31, %c0_32, %c0_33] : memref<1x32x1024xbf16, #tpu.memory_space<vmem>>, vector<1x32x1024xbf16>
      %49 = vector.shape_cast %48 : vector<1x32x1024xbf16> to vector<32x1024xbf16>
      %50 = vector.shape_cast %47 : vector<32x1024xbf16> to vector<1x32x1024xbf16>
      tpu.vector_store %arg8[%c0_31, %c0_32, %c0_33], %50 {strides = array<i32>} : memref<1x32x1024xbf16, #tpu.memory_space<vmem>>, vector<1x32x1024xbf16>,
    } else {
    }
    return
  }
  func.func @transform_0(%arg0: i32, %arg1: i32) -> (i32, i32, i32) {
    %c0_i32 = arith.constant 0 : i32
    %c0_i32_0 = arith.constant 0 : i32
    return %arg0, %c0_i32, %arg1 : i32, i32, i32
  }
  func.func @transform_1(%arg0: i32, %arg1: i32) -> (i32, i32, i32) {
    %c0_i32 = arith.constant 0 : i32
    %c0_i32_0 = arith.constant 0 : i32
    return %arg0, %c0_i32, %arg1 : i32, i32, i32
  }
  func.func @transform_2(%arg0: i32, %arg1: i32) -> (i32, i32) {
    %c0_i32 = arith.constant 0 : i32
    %c0_i32_0 = arith.constant 0 : i32
    %c0_i32_1 = arith.constant 0 : i32
    return %c0_i32, %c0_i32_0 : i32, i32
  }
  func.func @transform_3(%arg0: i32, %arg1: i32) -> (i32, i32) {
    %c0_i32 = arith.constant 0 : i32
    %c0_i32_0 = arith.constant 0 : i32
    %c0_i32_1 = arith.constant 0 : i32
    return %c0_i32, %c0_i32_0 : i32, i32
  }
  func.func @transform_4(%arg0: i32, %arg1: i32) -> (i32, i32) {
    %c0_i32 = arith.constant 0 : i32
    %c0_i32_0 = arith.constant 0 : i32
    %c0_i32_1 = arith.constant 0 : i32
    return %c0_i32, %c0_i32_0 : i32, i32
  }
  func.func @transform_5(%arg0: i32, %arg1: i32) -> (i32, i32) {
    %c0_i32 = arith.constant 0 : i32
    %c0_i32_0 = arith.constant 0 : i32
    %c0_i32_1 = arith.constant 0 : i32
    return %c0_i32, %c0_i32_0 : i32, i32
  }
  func.func @transform_6(%arg0: i32, %arg1: i32) -> (i32, i32, i32) {
    %c0_i32 = arith.constant 0 : i32
    %c0_i32_0 = arith.constant 0 : i32
    %c0_i32_1 = arith.constant 0 : i32
    return %arg0, %c0_i32, %c0_i32_0 : i32, i32, i32
  }
}

</mosaic_0001>

<bundles_post_ra>
// kernel: tpu_custom_call.1
= control target key start
LH: loop header
LB: loop body
LE: loop exit
PB: predicated region body
PF: predicated region fallthrough
CT: control target
= control target key end

     0   :  { %s2180_s0 = inlined_call_operand.hbm [shape: f32[2,64,1024], index: 0, kind: input, shape index: {}]   ;;  %s2181_s1 = inlined_call_operand.hbm [shape: f32[2,64,1024], index: 1, kind: input, shape index: {}]   ;;  %s2182_s2 = inlined_call_operand.vmem [shape: bf16[32,64], index: 2, kind: input, shape index: {}]   ;;  %s2183_s3 = inlined_call_operand.vmem [shape: f32[32,1], index: 3, kind: input, shape index: {}]   ;;  %s2184_s4 = inlined_call_operand.vmem [shape: f32[32,32], index: 4, kind: input, shape index: {}]   ;;  %s2185_s5 = inlined_call_operand.vmem [shape: f32[32,1], index: 5, kind: input, shape index: {}]   ;;  %s2186_s6 = inlined_call_operand.hbm [shape: bf16[2,32,1024], index: 6, kind: output, shape index: {}]  }
   0x1   :  { %2189 = sst [smem:[#allocation16_spill]] %s2180_s0 }
   0x2   :  { %11 = vsyncpa [#allocation5], 0 }
   0x3   :  { %13 = vsyncpa [#allocation5 + $0x1], 0 }
   0x4   :  { %14 = vsyncpa [#allocation8], 0 }
   0x5   :  { %16 = vsyncpa [#allocation8 + $0x1], 0 }
   0x6   :  { %17 = vsyncpa [#allocation6], 0 }
   0x7   :  { %19 = vsyncpa [#allocation6 + $0x1], 0  ;;  %s1631_s21 = smov 0   ;;  %s1633_s22 = smov 0  }
   0x8   :  { %s1635_s23 = smov 0   ;;  %s1637_s24 = smov 0  }
   0x9   :  { %s1639_s25 = smov 0   ;;  %s1641_s26 = smov 0  }
   0xa LB: > { %2190 = sst [smem:[#allocation13_spill]] %s1584_s25  ;;  %s1286_s27 = sadd.s32 4294967295, %s1588_s26   ;;  %s1588_s26 = sphi %s1641_s26, %s25_s26   ;;  %s1584_s25 = sphi %s1639_s25, %s2201_s25   ;;  %s1580_s24 = sphi %s1637_s24, %s2200_s24   ;;  %s1576_s23 = sphi %s1635_s23, %s2204_s23   ;;  %s1572_s22 = sphi %s1633_s22, %s2203_s22   ;;  %s1568_s21 = sphi %s1631_s21, %s2202_s21  }
   0xb   : > { %s1287_s28 = sadd.s32 4294967294, %s1588_s26   ;;  %s37_s29 = sadd.s32 1, %s1584_s25 }
   0xc   : > { %s46_s30 = sadd.s32 1, %s1576_s23  ;;  %p39_p0 = scmp.ge.s32.totalorder %s37_s29, 2 }
   0xd   : > { %p53_p1 = scmp.ne.s32.totalorder %s1576_s23, %s1572_s22  ;;  %p54_p2 = scmp.eq.s32.totalorder %s1588_s26, 0 }
   0xe   : > { %p59_p3 = scmp.ne.s32.totalorder %s1572_s22, %s1568_s21  ;;  %s2206_s29 = smov (%p39_p0, %s37_s29), 0 }
   0xf   : > { %2191 = sst [smem:[#allocation14_spill]] %s2206_s29  ;;  %p1672_p4 = por %p54_p2, %p53_p1 }
  0x10   : > { %p60_p5 = scmp.eq.s32.totalorder %s1286_s27, 0  ;;  %s41_s8 = ssub.s32 %s1584_s25, %s2206_s29 }
  0x11   : > { %p195_p6 = scmp.eq.s32.totalorder %s1286_s27, 1  ;;  %p44_p7 = scmp.eq.s32.totalorder %s41_s8, 0 }
  0x12   : > { %p1678_p8 = por %p60_p5, %p59_p3  ;;  %p201_p10 = scmp.eq.s32.totalorder %s1287_s28, 1 }
  0x13   : > { %p1682_p9 = por %p195_p6, %p53_p1  ;;  %p1289_p12 = scmp.ge.s32.totalorder %s1588_s26, 2 }
  0x14   : > { %s1687_s11 = scalar_select %p44_p7, %s1576_s23, %s46_s30  }
  0x15   : > { %p1689_p11 = por %p201_p10, %p59_p3  ;;  %p1367_p13 = scmp.lt.s32.totalorder %s1588_s26, 2 }
  0x16   : > { %2195 = sst [smem:[#allocation15_spill]] %s1687_s11  ;;  %s1696_s13 = sand.u32 1, %s1576_s23  }
  0x17   : > { %s1290_s14 = sshll.u32 %s1696_s13, 9  ;;  %s1337_s15 = sshll.u32 %s1584_s25, 9 }
  0x18   : > { %s2197_s0 = sld [smem:[#allocation16_spill]]  ;;  %s237_s19 = scalar_lea.vmem [#allocation4], %s1290_s14 }
  0x19   : > { %s247_s20 = sshll.u32 %s237_s19, 4  ;;  %p1705_p0 = pnand %p1367_p13, %p1672_p4  ;;  %s248_s20 = int_to_ptr.vmem [resolvable:$true] %s247_s20 }
  0x1a   : > { %p1296_p1 = scmp.ge.s32.totalorder %s1588_s26, 1  ;;  %s234_s30 = scalar_lea.sflag [#allocation5], %s1696_s13 }
  0x1b   : > { %s1590_s8 = smov 1024   ;;  %s1591_s29 = smov 64  }
  0x1c   : > { %p279_p2 = scmp.lt.s32.totalorder %s1588_s26, 3  ;;  %s261_s7 = scalar_lea.vmem [#allocation7], %s1290_s14 }
  0x1d   : > { %s258_s25 = scalar_lea.sflag [#allocation8], %s1696_s13 }
  0x1e   : > { %s244_s18 = scalar_lea.hbm %s2197_s0, %s1337_s15  ;;  %p280_p3 = pnand %p1296_p1, %p279_p2 }
  0x1f   : > { %s245_s27 = sshll.u32 %s244_s18, 4  ;;  %s268_s18 = scalar_lea.hbm %s2181_s1, %s1337_s15  ;;  %s246_s27 = int_to_ptr.hbm [resolvable:$true] %s245_s27 }
  0x20   : > { %1359 = dma.hbm_to_vmem [thread:$0]  (!%p1705_p0), %s246_s27, 8192, %s248_s20, %s234_s30, %s1590_s8, %s1590_s8, %s1591_s29  }
  0x21   : > { %s269_s19 = sshll.u32 %s268_s18, 4  ;;  %s271_s0 = sshll.u32 %s261_s7, 4  ;;  %s270_s19 = int_to_ptr.hbm [resolvable:$true] %s269_s19  ;;  %s272_s0 = int_to_ptr.vmem [resolvable:$true] %s271_s0 }
  0x22   : > { %1362 = dma.hbm_to_vmem [thread:$0]  (!%p1705_p0), %s270_s19, 8192, %s272_s0, %s258_s25, %s1590_s8, %s1590_s8, %s1591_s29  }
  0x23   : > { %283 = sbr.rel (%p280_p3) target bundleno = 700 (0x2bc), region = 44  ;;  %s1721_s11 = sand.u32 (!%p280_p3), 1, %s1572_s22  }
  0x24   : > { %s1297_s20 = sshll.u32 (!%p280_p3), %s1721_s11, 9  ;;  %s286_s27 = scalar_lea.sflag (!%p280_p3), [#allocation5], %s1721_s11 }
  0x25   : > { %s1725_s30 = scalar_lea.vmem (!%p280_p3), [#allocation4], %s1297_s20 }
  0x28   : > { %1555 = dma.done.wait (%p1678_p8), %s286_s27, 8192  }
  0x29   : > { %1557 = vsyncadd (%p1678_p8), %s286_s27, 4294959104  ;;  %s296_s13 = scalar_lea.sflag [#allocation8], %s1721_s11  ;;  %s1732_s0 = scalar_lea.vmem [#allocation7], %s1297_s20 }
  0x2a   : > { %1559 = dma.done.wait (%p1678_p8), %s296_s13, 8192  }
  0x2b   : > { %1561 = vsyncadd (%p1678_p8), %s296_s13, 4294959104  ;;  %v1592_v0 = vmov 0   ;;  %v394_v1 = vld [vmem:[%s1725_s30 + $0x180] sm:$0xff]  ;;  %v396_v6 = vld [vmem:[%s1725_s30 + $0x190] sm:$0xff]  ;;  %vm608_vm0 = vcmask 523264   ;;  %vm341_vm1 = vcmask 7168  }
  0x2c   : > { %1423 = vset.pattern.permute.xlu0 %v1592_v0  ;;  %1424 = vset.pattern.permute.xlu1 %v1592_v0  ;;  %v402_v2 = vld [vmem:[%s1725_s30 + $0x1c0] sm:$0xff]  ;;  %v404_v7 = vld [vmem:[%s1725_s30 + $0x1d0] sm:$0xff]  ;;  %v397_v11 = vld [vmem:[%s1725_s30 + $0x198] sm:$0xff]  ;;  %vm904_vm2 = vcmask 261120   ;;  %s1299_s7 = sshll.u32 %s1721_s11, 7  ;;  %s1341_s27 = sshll.u32 %s1580_s24, 7 }
  0x2d   : > { %1425 = vset.pattern.permute.xlu2 %v1592_v0  ;;  %v458_v3 = vld [vmem:[%s1732_s0 + $0x180] sm:$0xff]  ;;  %v460_v9 = vld [vmem:[%s1732_s0 + $0x190] sm:$0xff]  ;;  %v405_v14 = vld [vmem:[%s1725_s30 + $0x1d8] sm:$0xff]  ;;  %s2099_s20 = scalar_lea.vmem [#allocation9], %s1299_s7  ;;  %s1159_s29 = scalar_lea.sflag [#allocation6], %s1721_s11 }
  0x2e   : > { %v466_v4 = vld [vmem:[%s1732_s0 + $0x1c0] sm:$0xff]  ;;  %v522_v5 = vadd.f32 %v458_v3, %v394_v1  ;;  %v468_v10 = vld [vmem:[%s1732_s0 + $0x1d0] sm:$0xff]  ;;  %v524_v12 = vadd.f32 %v460_v9, %v396_v6  ;;  %v461_v15 = vld [vmem:[%s1732_s0 + $0x198] sm:$0xff]  ;;  %s1171_s24 = sshll.u32 %s2099_s20, 4  ;;  %s1522_s8 = scalar_lea.hbm %s2186_s6, 256  ;;  %s1172_s24 = int_to_ptr.vmem [resolvable:$true] %s1171_s24 }
  0x2f   : > { %v530_v8 = vadd.f32 %v466_v4, %v402_v2  ;;  %v532_v13 = vadd.f32 %v468_v10, %v404_v7  ;;  %v469_v16 = vld [vmem:[%s1732_s0 + $0x1d8] sm:$0xff]  ;;  %v525_v18 = vadd.f32 %v461_v15, %v397_v11  ;;  %v378_v20 = vld [vmem:[%s1725_s30 + $0x100] sm:$0xff]  ;;  %v380_v26 = vld [vmem:[%s1725_s30 + $0x110] sm:$0xff] }
  0x30   : > { %v533_v19 = vadd.f32 %v469_v16, %v405_v14  ;;  %v386_v21 = vld [vmem:[%s1725_s30 + $0x140] sm:$0xff]  ;;  %v388_v27 = vld [vmem:[%s1725_s30 + $0x150] sm:$0xff]  ;;  %v381_v32 = vld [vmem:[%s1725_s30 + $0x118] sm:$0xff] }
  0x31   : > { %v562_v17 = vpack.c.bf16 %v530_v8, %v522_v5  ;;  %v442_v22 = vld [vmem:[%s1732_s0 + $0x100] sm:$0xff]  ;;  %v564_v23 = vpack.c.bf16 %v532_v13, %v524_v12  ;;  %v444_v30 = vld [vmem:[%s1732_s0 + $0x110] sm:$0xff]  ;;  %v389_v35 = vld [vmem:[%s1725_s30 + $0x158] sm:$0xff] }
  0x32   : > { %v450_v24 = vld [vmem:[%s1732_s0 + $0x140] sm:$0xff]  ;;  %v506_v25 = vadd.f32 %v442_v22, %v378_v20  ;;  %v565_v28 = vpack.c.bf16 %v533_v19, %v525_v18  ;;  %v452_v31 = vld [vmem:[%s1732_s0 + $0x150] sm:$0xff]  ;;  %v508_v33 = vadd.f32 %v444_v30, %v380_v26  ;;  %v445_v36 = vld [vmem:[%s1732_s0 + $0x118] sm:$0xff] }
  0x33   : > { %1342 = vmatpush.bf16.msra.mxu1 %v562_v17  ;;  %v514_v29 = vadd.f32 %v450_v24, %v386_v21  ;;  %619 = vmatpush.bf16.msra.mxu0 %v562_v17  ;;  %v516_v34 = vadd.f32 %v452_v31, %v388_v27  ;;  %v453_v37 = vld [vmem:[%s1732_s0 + $0x158] sm:$0xff]  ;;  %v509_v39 = vadd.f32 %v445_v36, %v381_v32  ;;  %v362_v41 = vld [vmem:[%s1725_s30 + $0x80] sm:$0xff]  ;;  %v364_v47 = vld [vmem:[%s1725_s30 + $0x90] sm:$0xff] }
  0x34   : > { %657 = vmatpush.bf16.msra.mxu2 %v564_v23  ;;  %676 = vmatpush.bf16.msra.mxu3 %v565_v28  ;;  %v517_v40 = vadd.f32 %v453_v37, %v389_v35  ;;  %v370_v42 = vld [vmem:[%s1725_s30 + $0xc0] sm:$0xff]  ;;  %v372_v48 = vld [vmem:[%s1725_s30 + $0xd0] sm:$0xff]  ;;  %v365_v53 = vld [vmem:[%s1725_s30 + $0x98] sm:$0xff] }
  0x35   : > { %v554_v38 = vpack.c.bf16 %v514_v29, %v506_v25  ;;  %v426_v43 = vld [vmem:[%s1732_s0 + $0x80] sm:$0xff]  ;;  %v556_v44 = vpack.c.bf16 %v516_v34, %v508_v33  ;;  %v428_v51 = vld [vmem:[%s1732_s0 + $0x90] sm:$0xff]  ;;  %v373_v56 = vld [vmem:[%s1725_s30 + $0xd8] sm:$0xff] }
  0x36   : > { %v434_v45 = vld [vmem:[%s1732_s0 + $0xc0] sm:$0xff]  ;;  %v490_v46 = vadd.f32 %v426_v43, %v362_v41  ;;  %v557_v49 = vpack.c.bf16 %v517_v40, %v509_v39  ;;  %v436_v52 = vld [vmem:[%s1732_s0 + $0xd0] sm:$0xff]  ;;  %v492_v54 = vadd.f32 %v428_v51, %v364_v47  ;;  %v429_v57 = vld [vmem:[%s1732_s0 + $0x98] sm:$0xff] }
  0x37   : > { %1343 = vmatpush.bf16.msra.mxu1 %v554_v38  ;;  %v498_v50 = vadd.f32 %v434_v45, %v370_v42  ;;  %620 = vmatpush.bf16.msra.mxu0 %v554_v38  ;;  %v500_v55 = vadd.f32 %v436_v52, %v372_v48  ;;  %v437_v58 = vld [vmem:[%s1732_s0 + $0xd8] sm:$0xff]  ;;  %v493_v60 = vadd.f32 %v429_v57, %v365_v53  ;;  %v346_v62 = vld [vmem:[%s1725_s30] sm:$0xff]  ;;  %v348_v4 = vld [vmem:[%s1725_s30 + $0x10] sm:$0xff] }
  0x38   : > { %658 = vmatpush.bf16.msra.mxu2 %v556_v44  ;;  %677 = vmatpush.bf16.msra.mxu3 %v557_v49  ;;  %v501_v61 = vadd.f32 %v437_v58, %v373_v56  ;;  %v354_v63 = vld [vmem:[%s1725_s30 + $0x40] sm:$0xff]  ;;  %v356_v5 = vld [vmem:[%s1725_s30 + $0x50] sm:$0xff]  ;;  %v349_v10 = vld [vmem:[%s1725_s30 + $0x18] sm:$0xff] }
  0x39   : > { %v546_v59 = vpack.c.bf16 %v498_v50, %v490_v46  ;;  %v410_v0 = vld [vmem:[%s1732_s0] sm:$0xff]  ;;  %v548_v1 = vpack.c.bf16 %v500_v55, %v492_v54  ;;  %v412_v8 = vld [vmem:[%s1732_s0 + $0x10] sm:$0xff]  ;;  %v357_v13 = vld [vmem:[%s1725_s30 + $0x58] sm:$0xff] }
  0x3a   : > { %v418_v2 = vld [vmem:[%s1732_s0 + $0x40] sm:$0xff]  ;;  %v474_v3 = vadd.f32 %v410_v0, %v346_v62  ;;  %v549_v6 = vpack.c.bf16 %v501_v61, %v493_v60  ;;  %v420_v9 = vld [vmem:[%s1732_s0 + $0x50] sm:$0xff]  ;;  %v476_v11 = vadd.f32 %v412_v8, %v348_v4  ;;  %v413_v14 = vld [vmem:[%s1732_s0 + $0x18] sm:$0xff] }
  0x3b   : > { %1344 = vmatpush.bf16.msra.mxu1 %v546_v59  ;;  %v482_v7 = vadd.f32 %v418_v2, %v354_v63  ;;  %621 = vmatpush.bf16.msra.mxu0 %v546_v59  ;;  %v484_v12 = vadd.f32 %v420_v9, %v356_v5  ;;  %v421_v15 = vld [vmem:[%s1732_s0 + $0x58] sm:$0xff]  ;;  %v477_v17 = vadd.f32 %v413_v14, %v349_v10  ;;  %v1789_v19 = vld [vmem:[%s2182_s2 + $0x8] sm:$0xff]  ;;  %v1798_v25 = vld [vmem:[%s2182_s2] sm:$0xff] }
  0x3c   : > { %659 = vmatpush.bf16.msra.mxu2 %v548_v1  ;;  %678 = vmatpush.bf16.msra.mxu3 %v549_v6  ;;  %v485_v18 = vadd.f32 %v421_v15, %v357_v13  ;;  %v395_v20 = vld [vmem:[%s1725_s30 + $0x188] sm:$0xff]  ;;  %v577_v29 = vld [vmem:[%s2183_s3 + $0x18] sm:$0xff]  ;;  %v398_v34 = vld [vmem:[%s1725_s30 + $0x1a0] sm:$0xff] }
  0x3d   : > { %v538_v16 = vpack.c.bf16 %v482_v7, %v474_v3  ;;  %v403_v21 = vld [vmem:[%s1725_s30 + $0x1c8] sm:$0xff]  ;;  %v540_v22 = vpack.c.bf16 %v484_v12, %v476_v11  ;;  %595 = vperm.xlu0 %1423, %v577_v29   ;;  %v406_v38 = vld [vmem:[%s1725_s30 + $0x1e0] sm:$0xff]  ;;  %v576_v49 = vld [vmem:[%s2183_s3 + $0x10] sm:$0xff] }
  0x3e   : > { %v459_v23 = vld [vmem:[%s1732_s0 + $0x188] sm:$0xff]  ;;  %v541_v26 = vpack.c.bf16 %v485_v18, %v477_v17  ;;  %v462_v39 = vld [vmem:[%s1732_s0 + $0x1a0] sm:$0xff]  ;;  %v400_v13 = vld [vmem:[%s1725_s30 + $0x1b0] sm:$0xff] }
  0x3f   : > { %v467_v24 = vld [vmem:[%s1732_s0 + $0x1c8] sm:$0xff]  ;;  %1345 = vmatpush.bf16.msra.mxu1 %v538_v16  ;;  %v523_v27 = vadd.f32 %v459_v23, %v395_v20  ;;  %622 = vmatpush.bf16.msra.mxu0 %v538_v16  ;;  %v470_v40 = vld [vmem:[%s1732_s0 + $0x1e0] sm:$0xff]  ;;  %v526_v41 = vadd.f32 %v462_v39, %v398_v34  ;;  %v408_v14 = vld [vmem:[%s1725_s30 + $0x1f0] sm:$0xff] }
  0x40   : > { %v531_v28 = vadd.f32 %v467_v24, %v403_v21  ;;  %v379_v30 = vld [vmem:[%s1725_s30 + $0x108] sm:$0xff]  ;;  %660 = vmatpush.bf16.msra.mxu2 %v540_v22  ;;  %679 = vmatpush.bf16.msra.mxu3 %v541_v26  ;;  %v534_v42 = vadd.f32 %v470_v40, %v406_v38  ;;  %v382_v50 = vld [vmem:[%s1725_s30 + $0x120] sm:$0xff]  ;;  %v464_v18 = vld [vmem:[%s1732_s0 + $0x1b0] sm:$0xff] }
  0x41   : > { %v387_v31 = vld [vmem:[%s1725_s30 + $0x148] sm:$0xff]  ;;  %v390_v53 = vld [vmem:[%s1725_s30 + $0x160] sm:$0xff]  ;;  %v472_v20 = vld [vmem:[%s1732_s0 + $0x1f0] sm:$0xff]  ;;  %v528_v23 = vadd.f32 %v464_v18, %v400_v13 }
  0x42   : > { %v443_v32 = vld [vmem:[%s1732_s0 + $0x108] sm:$0xff]  ;;  %v563_v35 = vpack.c.bf16 %v531_v28, %v523_v27  ;;  %1309 = vmatmul.msk.bf16.vlgmr.msra.gmra.mxu1 %vm608_vm0, %v1789_v19  ;;  %1308 = vmatmul.msk.bf16.vlgmr.msra.gmra.mxu0 %vm608_vm0, %v1798_v25  ;;  %v566_v51 = vpack.c.bf16 %v534_v42, %v526_v41  ;;  %v446_v54 = vld [vmem:[%s1732_s0 + $0x120] sm:$0xff]  ;;  %v401_v21 = vld [vmem:[%s1725_s30 + $0x1b8] sm:$0xff]  ;;  %v536_v24 = vadd.f32 %v472_v20, %v408_v14 }
  0x43   : > { %v451_v33 = vld [vmem:[%s1732_s0 + $0x148] sm:$0xff]  ;;  %v507_v36 = vadd.f32 %v443_v32, %v379_v30  ;;  %1312 = vmatmul.msk.bf16.vlgmr.msra.gmra.mxu2 %vm608_vm0, %v1798_v25  ;;  %1314 = vmatmul.msk.bf16.vlgmr.msra.gmra.mxu3 %vm608_vm0, %v1798_v25  ;;  %v454_v55 = vld [vmem:[%s1732_s0 + $0x160] sm:$0xff]  ;;  %v510_v56 = vadd.f32 %v446_v54, %v382_v50  ;;  %v409_v26 = vld [vmem:[%s1725_s30 + $0x1f8] sm:$0xff] }
  0x44   : > { %v515_v37 = vadd.f32 %v451_v33, %v387_v31  ;;  %v363_v43 = vld [vmem:[%s1725_s30 + $0x88] sm:$0xff]  ;;  %638 = vmatpush.bf16.msrb.mxu1 %v563_v35  ;;  %v518_v57 = vadd.f32 %v454_v55, %v390_v53  ;;  %695 = vmatpush.bf16.msrb.mxu0 %v566_v51  ;;  %v366_v62 = vld [vmem:[%s1725_s30 + $0xa0] sm:$0xff]  ;;  %v465_v27 = vld [vmem:[%s1732_s0 + $0x1b8] sm:$0xff]  ;;  %v568_v34 = vpack.c.bf16 %v536_v24, %v528_v23 }
  0x45   : > { %v371_v44 = vld [vmem:[%s1725_s30 + $0xc8] sm:$0xff]  ;;  %v374_v63 = vld [vmem:[%s1725_s30 + $0xe0] sm:$0xff]  ;;  %590 = vperm.xlu0 %1423, %v576_v49   ;;  %v473_v28 = vld [vmem:[%s1732_s0 + $0x1f8] sm:$0xff]  ;;  %v529_v29 = vadd.f32 %v465_v27, %v401_v21 }
  0x46   : > { %v427_v45 = vld [vmem:[%s1732_s0 + $0x88] sm:$0xff]  ;;  %v555_v46 = vpack.c.bf16 %v515_v37, %v507_v36  ;;  %v558_v1 = vpack.c.bf16 %v518_v57, %v510_v56  ;;  %v430_v4 = vld [vmem:[%s1732_s0 + $0xa0] sm:$0xff]  ;;  %v537_v30 = vadd.f32 %v473_v28, %v409_v26  ;;  %v384_v31 = vld [vmem:[%s1725_s30 + $0x130] sm:$0xff]  ;;  %733 = vmatpush.bf16.msrb.mxu2 %v568_v34 }
  0x47   : > { %v435_v47 = vld [vmem:[%s1732_s0 + $0xc8] sm:$0xff]  ;;  %v491_v48 = vadd.f32 %v427_v45, %v363_v43  ;;  %v438_v5 = vld [vmem:[%s1732_s0 + $0xe0] sm:$0xff]  ;;  %v494_v7 = vadd.f32 %v430_v4, %v366_v62  ;;  %v392_v32 = vld [vmem:[%s1725_s30 + $0x170] sm:$0xff] }
  0x48   : > { %v499_v52 = vadd.f32 %v435_v47, %v371_v44  ;;  %v347_v58 = vld [vmem:[%s1725_s30 + $0x8] sm:$0xff]  ;;  %639 = vmatpush.bf16.msrb.mxu1 %v555_v46  ;;  %v502_v8 = vadd.f32 %v438_v5, %v374_v63  ;;  %v350_v9 = vld [vmem:[%s1725_s30 + $0x20] sm:$0xff]  ;;  %696 = vmatpush.bf16.msrb.mxu0 %v558_v1  ;;  %v448_v33 = vld [vmem:[%s1732_s0 + $0x130] sm:$0xff]  ;;  %v569_v40 = vpack.c.bf16 %v537_v30, %v529_v29 }
  0x49   : > { %v355_v59 = vld [vmem:[%s1725_s30 + $0x48] sm:$0xff]  ;;  %v358_v10 = vld [vmem:[%s1725_s30 + $0x60] sm:$0xff]  ;;  %v456_v35 = vld [vmem:[%s1732_s0 + $0x170] sm:$0xff]  ;;  %v512_v36 = vadd.f32 %v448_v33, %v384_v31 }
  0x4a   : > { %v411_v60 = vld [vmem:[%s1732_s0 + $0x8] sm:$0xff]  ;;  %v547_v0 = vpack.c.bf16 %v499_v52, %v491_v48  ;;  %v414_v11 = vld [vmem:[%s1732_s0 + $0x20] sm:$0xff]  ;;  %v550_v15 = vpack.c.bf16 %v502_v8, %v494_v7  ;;  %v385_v37 = vld [vmem:[%s1725_s30 + $0x138] sm:$0xff]  ;;  %v520_v41 = vadd.f32 %v456_v35, %v392_v32  ;;  %752 = vmatpush.bf16.msrb.mxu3 %v569_v40 }
  0x4b   : > { %v419_v61 = vld [vmem:[%s1732_s0 + $0x48] sm:$0xff]  ;;  %v475_v2 = vadd.f32 %v411_v60, %v347_v58  ;;  %v422_v12 = vld [vmem:[%s1732_s0 + $0x60] sm:$0xff]  ;;  %v478_v16 = vadd.f32 %v414_v11, %v350_v9  ;;  %v393_v38 = vld [vmem:[%s1725_s30 + $0x178] sm:$0xff] }
  0x4c   : > { %v483_v3 = vadd.f32 %v419_v61, %v355_v59  ;;  %v575_v6 = vld [vmem:[%s2183_s3 + $0x8] sm:$0xff]  ;;  %v486_v17 = vadd.f32 %v422_v12, %v358_v10  ;;  %640 = vmatpush.bf16.msrb.mxu1 %v547_v0  ;;  %697 = vmatpush.bf16.msrb.mxu0 %v550_v15  ;;  %v449_v42 = vld [vmem:[%s1732_s0 + $0x138] sm:$0xff]  ;;  %v574_v44 = vld [vmem:[%s2183_s3] sm:$0xff]  ;;  %v560_v50 = vpack.c.bf16 %v520_v41, %v512_v36 }
  0x4d   : > { %585 = vperm.xlu1 %1424, %v575_v6   ;;  %v457_v43 = vld [vmem:[%s1732_s0 + $0x178] sm:$0xff]  ;;  %v513_v45 = vadd.f32 %v449_v42, %v385_v37  ;;  %v368_v47 = vld [vmem:[%s1725_s30 + $0xb0] sm:$0xff]  ;;  %v399_v8 = vld [vmem:[%s1725_s30 + $0x1a8] sm:$0xff] }
  0x4e   : > { %v539_v22 = vpack.c.bf16 %v483_v3, %v475_v2  ;;  %v542_v39 = vpack.c.bf16 %v486_v17, %v478_v16  ;;  %v521_v46 = vadd.f32 %v457_v43, %v393_v38  ;;  %v376_v48 = vld [vmem:[%s1725_s30 + $0xf0] sm:$0xff]  ;;  %v369_v53 = vld [vmem:[%s1725_s30 + $0xb8] sm:$0xff]  ;;  %734 = vmatpush.bf16.msrb.mxu2 %v560_v50  ;;  %v407_v9 = vld [vmem:[%s1725_s30 + $0x1e8] sm:$0xff] }
  0x4f   : > { %v432_v49 = vld [vmem:[%s1732_s0 + $0xb0] sm:$0xff]  ;;  %v377_v54 = vld [vmem:[%s1725_s30 + $0xf8] sm:$0xff]  ;;  %v463_v13 = vld [vmem:[%s1732_s0 + $0x1a8] sm:$0xff] }
  0x50   : > { %641 = vmatpush.bf16.msrb.mxu1 %v539_v22  ;;  %v440_v51 = vld [vmem:[%s1732_s0 + $0xf0] sm:$0xff]  ;;  %v496_v52 = vadd.f32 %v432_v49, %v368_v47  ;;  %v561_v55 = vpack.c.bf16 %v521_v46, %v513_v45  ;;  %v433_v57 = vld [vmem:[%s1732_s0 + $0xb8] sm:$0xff]  ;;  %698 = vmatpush.bf16.msrb.mxu0 %v542_v39  ;;  %v471_v14 = vld [vmem:[%s1732_s0 + $0x1e8] sm:$0xff]  ;;  %v527_v16 = vadd.f32 %v463_v13, %v399_v8 }
  0x51   : > { %v504_v56 = vadd.f32 %v440_v51, %v376_v48  ;;  %v441_v58 = vld [vmem:[%s1732_s0 + $0xf8] sm:$0xff]  ;;  %v352_v59 = vld [vmem:[%s1725_s30 + $0x30] sm:$0xff]  ;;  %v497_v60 = vadd.f32 %v433_v57, %v369_v53  ;;  %v383_v15 = vld [vmem:[%s1725_s30 + $0x128] sm:$0xff]  ;;  %v535_v17 = vadd.f32 %v471_v14, %v407_v9 }
  0x52   : > { %v505_v61 = vadd.f32 %v441_v58, %v377_v54  ;;  %v360_v62 = vld [vmem:[%s1725_s30 + $0x70] sm:$0xff]  ;;  %v353_v1 = vld [vmem:[%s1725_s30 + $0x38] sm:$0xff]  ;;  %753 = vmatpush.bf16.msrb.mxu3 %v561_v55  ;;  %v391_v18 = vld [vmem:[%s1725_s30 + $0x168] sm:$0xff] }
  0x53   : > { %1310 = vmatmul.msk.bf16.vlgmr.msrb.gmra.mxu1 %vm608_vm0, %v1798_v25  ;;  %v416_v63 = vld [vmem:[%s1732_s0 + $0x30] sm:$0xff]  ;;  %1313 = vmatmul.msk.bf16.gmra.mxu2 %vm608_vm0, %v1789_v19  ;;  %v361_v2 = vld [vmem:[%s1725_s30 + $0x78] sm:$0xff]  ;;  %v552_v4 = vpack.c.bf16 %v504_v56, %v496_v52  ;;  %v447_v20 = vld [vmem:[%s1732_s0 + $0x128] sm:$0xff]  ;;  %v567_v27 = vpack.c.bf16 %v535_v17, %v527_v16 }
  0x54   : > { %v424_v0 = vld [vmem:[%s1732_s0 + $0x70] sm:$0xff]  ;;  %v417_v3 = vld [vmem:[%s1732_s0 + $0x38] sm:$0xff]  ;;  %1315 = vmatmul.msk.bf16.gmra.mxu3 %vm608_vm0, %v1789_v19  ;;  %v480_v5 = vadd.f32 %v416_v63, %v352_v59  ;;  %1316 = vmatmul.msk.bf16.vlgmr.msrb.gmra.mxu0 %vm608_vm0, %v1798_v25  ;;  %v553_v10 = vpack.c.bf16 %v505_v61, %v497_v60  ;;  %v455_v21 = vld [vmem:[%s1732_s0 + $0x168] sm:$0xff]  ;;  %v511_v22 = vadd.f32 %v447_v20, %v383_v15 }
  0x55   : > { %580 = vperm.xlu1 %1424, %v574_v44   ;;  %v488_v6 = vadd.f32 %v424_v0, %v360_v62  ;;  %v425_v7 = vld [vmem:[%s1732_s0 + $0x78] sm:$0xff]  ;;  %v481_v11 = vadd.f32 %v417_v3, %v353_v1  ;;  %v519_v23 = vadd.f32 %v455_v21, %v391_v18  ;;  %v367_v24 = vld [vmem:[%s1725_s30 + $0xa8] sm:$0xff]  ;;  %735 = vmatpush.bf16.msrb.mxu2 %v552_v4 }
  0x56   : > { %v489_v12 = vadd.f32 %v425_v7, %v361_v2  ;;  %v375_v28 = vld [vmem:[%s1725_s30 + $0xe8] sm:$0xff]  ;;  %754 = vmatpush.bf16.msrb.mxu3 %v553_v10  ;;  %714 = vmatpush.bf16.msra.mxu1 %v567_v27 }
  0x57   : > { %v544_v26 = vpack.c.bf16 %v488_v6, %v480_v5  ;;  %v431_v29 = vld [vmem:[%s1732_s0 + $0xa8] sm:$0xff]  ;;  %v559_v32 = vpack.c.bf16 %v519_v23, %v511_v22 }
  0x58   : > { %v439_v30 = vld [vmem:[%s1732_s0 + $0xe8] sm:$0xff]  ;;  %v545_v31 = vpack.c.bf16 %v489_v12, %v481_v11  ;;  %v495_v33 = vadd.f32 %v431_v29, %v367_v24 }
  0x59   : > { %v503_v34 = vadd.f32 %v439_v30, %v375_v28  ;;  %v351_v35 = vld [vmem:[%s1725_s30 + $0x28] sm:$0xff]  ;;  %736 = vmatpush.bf16.msrb.mxu2 %v544_v26 }
  0x5a   : > { %v359_v36 = vld [vmem:[%s1725_s30 + $0x68] sm:$0xff]  ;;  %755 = vmatpush.bf16.msrb.mxu3 %v545_v31  ;;  %715 = vmatpush.bf16.msra.mxu1 %v559_v32 }
  0x5b   : > { %v415_v37 = vld [vmem:[%s1732_s0 + $0x28] sm:$0xff]  ;;  %v551_v39 = vpack.c.bf16 %v503_v34, %v495_v33 }
  0x5c   : > { %v423_v38 = vld [vmem:[%s1732_s0 + $0x68] sm:$0xff]  ;;  %v479_v40 = vadd.f32 %v415_v37, %v351_v35  ;;  %s1170_s0 = scalar_lea.hbm %s2186_s6, %s1341_s27 }
  0x5d   : > { %v487_v41 = vadd.f32 %v423_v38, %v359_v36  ;;  %s1173_s25 = sshll.u32 %s1170_s0, 4  ;;  %s1174_s25 = int_to_ptr.hbm [resolvable:$true] %s1173_s25 }
  0x5e   : > { %716 = vmatpush.bf16.msra.mxu1 %v551_v39  ;;  %s1516_s9 = sshra.s32 %s1174_s25, 4  ;;  %s1517_s9 = int_to_ptr.hbm [resolvable:$true] %s1516_s9 }
  0x5f   : > { %v543_v42 = vpack.c.bf16 %v487_v41, %v479_v40  ;;  %s1518_s14 = scalar_lea.hbm %s1517_s9, 128  ;;  %p1523_p7 = scmp.lt.s32.totalorder %s1517_s9, %s2186_s6 }
  0x60   : > { %p1519_p4 = scmp.ne.s32.totalorder %s1517_s9, %s1518_s14  ;;  %p1524_p8 = scmp.lt.s32.totalorder %s1522_s8, %s1518_s14 }
  0x62   : > { %717 = vmatpush.bf16.msra.mxu1 %v543_v42  ;;  %p1520_p5 = pnand %p1519_p4, %p1682_p9  ;;  %p1525_p10 = por %p1524_p8, %p1523_p7 }
  0x63   : > { %1311 = vmatmul.msk.bf16.gmra.mxu1 %vm608_vm0, %v1789_v19  ;;  %1320 = vmatmul.msk.bf16.vlgmr.msrb.gmra.mxu2 %vm608_vm0, %v1798_v25 }
  0x64   : > { %1322 = vmatmul.msk.bf16.vlgmr.msrb.gmra.mxu3 %vm608_vm0, %v1798_v25  ;;  %1317 = vmatmul.msk.bf16.gmra.mxu0 %vm608_vm0, %v1789_v19  ;;  %p1521_p6 = pneg %p1520_p5 }
  0x66   : > { %p1526_p13 = pnand %p1525_p10, %p1521_p6 }
  0x73   : > { %1318 = vmatmul.msk.bf16.vlgmr.msra.gmra.mxu1 %vm608_vm0, %v1798_v25  ;;  %1321 = vmatmul.msk.bf16.gmra.mxu2 %vm608_vm0, %v1789_v19 }
  0x74   : > { %1323 = vmatmul.msk.bf16.gmra.mxu3 %vm608_vm0, %v1789_v19 }
  0x83   : > { %1319 = vmatmul.msk.bf16.gmra.mxu1 %vm608_vm0, %v1789_v19 }
  0xaf   : > { %v1929_v53 = vpop.permute.xlu0 %595 }
  0xb7   : > { %v1952_v5 = vpop.permute.xlu0 %590 }
  0xbf   : > { %v1920_v43 = vpop.permute.xlu1 %585  ;;  %v629_v44 = vpop.f32.mrf.mxu1 }
  0xc0   : > { %v624_v50 = vpop.f32.mrf.mxu0  ;;  %v1972_v18 = vadd.f32 %v629_v44, %v1952_v5 }
  0xc2   : > { %v783_v29 = vmax.f32 %v1972_v18, 0.0 }
  0xc6   : > { %v662_v45 = vpop.f32.mrf.mxu2  ;;  %v681_v48 = vpop.f32.mrf.mxu3 }
  0xc7   : > { %v1922_v46 = vpop.permute.xlu1 %580  ;;  %v631_v47 = vpop.f32.mrf.mxu1 }
  0xc8   : > { %v663_v49 = vadd.f32 %v662_v45, %v1922_v46  ;;  %v1926_v25 = vadd.f32 %v681_v48, %v1922_v46  ;;  %v625_v19 = vadd.f32 %v624_v50, %v1922_v46  ;;  %v626_v1 = vpop.f32.mrf.mxu0  ;;  %v632_v34 = vadd.f32 %v631_v47, %v1929_v53 }
  0xc9   : > { %v627_v2 = vadd.f32 %v626_v1, %v1920_v43 }
  0xca   : > { %v769_v51 = vmax.f32 %v663_v49, 0.0  ;;  %v770_v52 = vmax.f32 %v1926_v25, 0.0  ;;  %v767_v60 = vmax.f32 %v625_v19, 0.0  ;;  %v791_v42 = vmax.f32 %v632_v34, 0.0 }
  0xcb   : > { %v775_v10 = vmax.f32 %v627_v2, 0.0 }
  0xcc   : > { %v1934_v54 = vpack.c.bf16 %v770_v52, %v769_v51 }
  0xce   : > { %v664_v55 = vpop.f32.mrf.mxu2  ;;  %v683_v58 = vpop.f32.mrf.mxu3 }
  0xcf   : > { %v1937_v57 = vadd.f32 %v664_v55, %v1920_v43  ;;  %v1941_v61 = vadd.f32 %v683_v58, %v1920_v43 }
  0xd0   : > { %v643_v56 = vpop.f32.mrf.mxu1 }
  0xd1   : > { %v644_v59 = vadd.f32 %v643_v56, %v1922_v46  ;;  %v777_v62 = vmax.f32 %v1937_v57, 0.0  ;;  %v778_v0 = vmax.f32 %v1941_v61, 0.0  ;;  %v700_v24 = vpop.f32.mrf.mxu0 }
  0xd2   : > { %v701_v48 = vadd.f32 %v700_v24, %v1922_v46 }
  0xd3   : > { %v768_v63 = vmax.f32 %v644_v59, 0.0  ;;  %v1950_v4 = vpack.c.bf16 %v778_v0, %v777_v62 }
  0xd4   : > { %v771_v57 = vmax.f32 %v701_v48, 0.0 }
  0xd5   : > { %v1946_v3 = vpack.c.bf16 %v768_v63, %v767_v60  ;;  %v803_v35 = vadd.f32 %v768_v63, %v767_v60 }
  0xd6   : > { %v667_v6 = vpop.f32.mrf.mxu2 }
  0xd7   : > { %v1955_v8 = vadd.f32 %v667_v6, %v1952_v5  ;;  %v686_v9 = vpop.f32.mrf.mxu3  ;;  %v804_v45 = vadd.f32 %v803_v35, %v769_v51 }
  0xd8   : > { %v645_v7 = vpop.f32.mrf.mxu1  ;;  %v1959_v12 = vadd.f32 %v686_v9, %v1952_v5 }
  0xd9   : > { %v646_v11 = vadd.f32 %v645_v7, %v1920_v43  ;;  %v785_v13 = vmax.f32 %v1955_v8, 0.0  ;;  %v702_v49 = vpop.f32.mrf.mxu0  ;;  %v805_v58 = vadd.f32 %v804_v45, %v770_v52 }
  0xda   : > { %v786_v15 = vmax.f32 %v1959_v12, 0.0  ;;  %v703_v7 = vadd.f32 %v702_v49, %v1920_v43  ;;  %v1593_v49 = vmov 0.0  }
  0xdb   : > { %v776_v14 = vmax.f32 %v646_v11, 0.0  ;;  %v806_v11 = vadd.f32 %v805_v58, %v771_v57  ;;  %342 = vst.msk [vmem:[#allocation3] sm:$0xff] %vm341_vm1, %v1593_v49 }
  0xdc   : > { %v1969_v17 = vpack.c.bf16 %v786_v15, %v785_v13  ;;  %343 = vst.msk [vmem:[#allocation3 + $0x8] sm:$0xff] %vm341_vm1, %v1593_v49 }
  0xdd   : > { %v1963_v16 = vpack.c.bf16 %v776_v14, %v775_v10  ;;  %v812_v56 = vadd.f32 %v776_v14, %v775_v10  ;;  %344 = vst.msk [vmem:[#allocation3 + $0x10] sm:$0xff] %vm341_vm1, %v1593_v49 }
  0xde   : > { %v669_v20 = vpop.f32.mrf.mxu2  ;;  %345 = vst.msk [vmem:[#allocation3 + $0x18] sm:$0xff] %vm341_vm1, %v1593_v49 }
  0xdf   : > { %v1975_v22 = vadd.f32 %v669_v20, %v1929_v53  ;;  %v688_v23 = vpop.f32.mrf.mxu3  ;;  %v813_v6 = vadd.f32 %v812_v56, %v777_v62 }
  0xe0   : > { %v648_v21 = vpop.f32.mrf.mxu1  ;;  %v1981_v27 = vadd.f32 %v688_v23, %v1929_v53  ;;  %v779_v23 = vmax.f32 %v703_v7, 0.0 }
  0xe1   : > { %v1978_v26 = vadd.f32 %v648_v21, %v1952_v5  ;;  %v793_v28 = vmax.f32 %v1975_v22, 0.0  ;;  %v705_v14 = vpop.f32.mrf.mxu0  ;;  %v814_v24 = vadd.f32 %v813_v6, %v778_v0 }
  0xe2   : > { %v794_v31 = vmax.f32 %v1981_v27, 0.0  ;;  %v799_v27 = vld [vmem:[#allocation3] sm:$0xff] }
  0xe3   : > { %v784_v30 = vmax.f32 %v1978_v26, 0.0 }
  0xe4   : > { %v1997_v33 = vpack.c.bf16 %v794_v31, %v793_v28 }
  0xe5   : > { %v1991_v32 = vpack.c.bf16 %v784_v30, %v783_v29 }
  0xe6   : > { %v738_v36 = vpop.f32.mrf.mxu2 }
  0xe7   : > { %v739_v38 = vadd.f32 %v738_v36, %v1922_v46  ;;  %v757_v39 = vpop.f32.mrf.mxu3 }
  0xe8   : > { %v650_v37 = vpop.f32.mrf.mxu1  ;;  %v758_v41 = vadd.f32 %v757_v39, %v1922_v46  ;;  %v815_v39 = vadd.f32 %v814_v24, %v779_v23 }
  0xe9   : > { %v651_v40 = vadd.f32 %v650_v37, %v1929_v53  ;;  %v773_v44 = vmax.f32 %v739_v38, 0.0 }
  0xea   : > { %v774_v19 = vmax.f32 %v758_v41, 0.0 }
  0xeb   : > { %v792_v50 = vmax.f32 %v651_v40, 0.0 }
  0xec   : > { %v2006_v47 = vpack.c.bf16 %v774_v19, %v773_v44 }
  0xed   : > { %v2004_v55 = vpack.c.bf16 %v792_v50, %v791_v42 }
  0xee   : > { %v740_v59 = vpop.f32.mrf.mxu2 }
  0xef   : > { %v741_v63 = vadd.f32 %v740_v59, %v1920_v43  ;;  %v759_v1 = vpop.f32.mrf.mxu3 }
  0xf0   : > { %v719_v60 = vpop.f32.mrf.mxu1  ;;  %v760_v2 = vadd.f32 %v759_v1, %v1920_v43 }
  0xf1   : > { %v720_v51 = vadd.f32 %v719_v60, %v1922_v46  ;;  %v781_v9 = vmax.f32 %v741_v63, 0.0 }
  0xf2   : > { %v782_v10 = vmax.f32 %v760_v2, 0.0  ;;  %v821_v2 = vadd.f32 %v784_v30, %v783_v29 }
  0xf3   : > { %v772_v20 = vmax.f32 %v720_v51, 0.0 }
  0xf4   : > { %v2016_v52 = vpack.c.bf16 %v782_v10, %v781_v9  ;;  %v822_v18 = vadd.f32 %v821_v2, %v785_v13 }
  0xf5   : > { %v807_v21 = vadd.f32 %v806_v11, %v772_v20  ;;  %v2014_v25 = vpack.c.bf16 %v772_v20, %v771_v57 }
  0xf6   : > { %v743_v46 = vpop.f32.mrf.mxu2 }
  0xf7   : > { %v744_v62 = vadd.f32 %v743_v46, %v1952_v5  ;;  %v762_v35 = vpop.f32.mrf.mxu3  ;;  %v808_v36 = vadd.f32 %v807_v21, %v773_v44  ;;  %v830_v44 = vadd.f32 %v792_v50, %v791_v42 }
  0xf8   : > { %v721_v34 = vpop.f32.mrf.mxu1  ;;  %v763_v38 = vadd.f32 %v762_v35, %v1952_v5 }
  0xf9   : > { %v722_v37 = vadd.f32 %v721_v34, %v1920_v43  ;;  %v789_v40 = vmax.f32 %v744_v62, 0.0  ;;  %v809_v41 = vadd.f32 %v808_v36, %v774_v19  ;;  %v706_v43 = vadd.f32 %v705_v14, %v1952_v5  ;;  %v707_v19 = vpop.f32.mrf.mxu0 }
  0xfa   : > { %v790_v48 = vmax.f32 %v763_v38, 0.0  ;;  %v831_v7 = vadd.f32 %v830_v44, %v793_v28  ;;  %v708_v11 = vadd.f32 %v707_v19, %v1929_v53  ;;  %v823_v28 = vadd.f32 %v822_v18, %v786_v15 }
  0xfb   : > { %v780_v45 = vmax.f32 %v722_v37, 0.0  ;;  %810 = vadd.xlane.f32.xlu1 %v809_v41  ;;  %v787_v6 = vmax.f32 %v706_v43, 0.0  ;;  %v802_v37 = vld [vmem:[#allocation3 + $0x18] sm:$0xff]  ;;  %v801_v41 = vld [vmem:[#allocation3 + $0x10] sm:$0xff] }
  0xfc   : > { %v2026_v56 = vpack.c.bf16 %v790_v48, %v789_v40  ;;  %v795_v26 = vmax.f32 %v708_v11, 0.0  ;;  %v832_v29 = vadd.f32 %v831_v7, %v794_v31  ;;  %v901_v7 = vld [vmem:[%s2185_s5 + $0x8] sm:$0xff] }
  0xfd   : > { %v816_v61 = vadd.f32 %v815_v39, %v780_v45  ;;  %v2024_v0 = vpack.c.bf16 %v780_v45, %v779_v23  ;;  %v824_v46 = vadd.f32 %v823_v28, %v787_v6  ;;  %v902_v28 = vld [vmem:[%s2185_s5 + $0x10] sm:$0xff] }
  0xfe   : > { %v745_v57 = vpop.f32.mrf.mxu2 }
  0xff   : > { %v746_v59 = vadd.f32 %v745_v57, %v1929_v53  ;;  %v764_v60 = vpop.f32.mrf.mxu3  ;;  %v817_v63 = vadd.f32 %v816_v61, %v781_v9 }
 0x100   : > { %v724_v58 = vpop.f32.mrf.mxu1  ;;  %v765_v51 = vadd.f32 %v764_v60, %v1929_v53  ;;  %v899_v60 = vld [vmem:[%s2184_s4 + $0x18] sm:$0xff] }
 0x101   : > { %v725_v1 = vadd.f32 %v724_v58, %v1952_v5  ;;  %v797_v42 = vmax.f32 %v746_v59, 0.0  ;;  %v818_v50 = vadd.f32 %v817_v63, %v782_v10  ;;  %v833_v10 = vadd.f32 %v832_v29, %v795_v26  ;;  %v896_v59 = vld [vmem:[%s2184_s4] sm:$0xff]  ;;  %v897_v63 = vld [vmem:[%s2184_s4 + $0x8] sm:$0xff] }
 0x102   : > { %v798_v14 = vmax.f32 %v765_v51, 0.0  ;;  %v900_v51 = vld [vmem:[%s2185_s5] sm:$0xff] }
 0x103   : > { %v788_v20 = vmax.f32 %v725_v1, 0.0  ;;  %819 = vadd.xlane.f32.xlu0 %v818_v50  ;;  %v898_v1 = vld [vmem:[%s2184_s4 + $0x10] sm:$0xff]  ;;  %v903_v50 = vld [vmem:[%s2185_s5 + $0x18] sm:$0xff] }
 0x104   : > { %v2044_v5 = vpack.c.bf16 %v798_v14, %v797_v42 }
 0x105   : > { %v2042_v9 = vpack.c.bf16 %v788_v20, %v787_v6  ;;  %v825_v62 = vadd.f32 %v824_v46, %v788_v20 }
 0x107   : > { %v826_v13 = vadd.f32 %v825_v62, %v789_v40 }
 0x108   : > { %v726_v30 = vpop.f32.mrf.mxu1 }
 0x109   : > { %v727_v22 = vadd.f32 %v726_v30, %v1929_v53  ;;  %v827_v35 = vadd.f32 %v826_v13, %v790_v48  ;;  %v800_v53 = vld [vmem:[#allocation3 + $0x8] sm:$0xff] }
 0x10b   : > { %v796_v21 = vmax.f32 %v727_v22, 0.0 }
 0x10d   : > { %v834_v23 = vadd.f32 %v833_v10, %v796_v21  ;;  %v2053_v24 = vpack.c.bf16 %v796_v21, %v795_v26 }
 0x10f   : > { %v835_v34 = vadd.f32 %v834_v23, %v797_v42 }
 0x111   : > { %v836_v8 = vadd.f32 %v835_v34, %v798_v14 }
 0x113   : > { %837 = vadd.xlane.f32.xlu2 %v836_v8 }
 0x11b   : > { %828 = vadd.xlane.f32.xlu2 %v827_v35 }
 0x16e   : > { %v811_v31 = vpop.xlane.xlu1 %810 }
 0x16f   : > { %v839_v36 = vadd.f32 %v811_v31, %v799_v27 }
 0x171   : > { %844 = vst.msk [vmem:[#allocation3] sm:$0xff] %vm341_vm1, %v839_v36 }
 0x176   : > { %v820_v12 = vpop.xlane.xlu0 %819 }
 0x177   : > { %v840_v15 = vadd.f32 %v820_v12, %v800_v53 }
 0x178   : > { %v888_v19 = vld [vmem:[#allocation3] sm:$0xff] }
 0x179   : > { %845 = vst.msk [vmem:[#allocation3 + $0x8] sm:$0xff] %vm341_vm1, %v840_v15  ;;  %v892_v58 = vmul.f32 0.0009765625, %v888_v19 }
 0x180   : > { %v889_v43 = vld [vmem:[#allocation3 + $0x8] sm:$0xff] }
 0x181   : > { %v893_v57 = vmul.f32 0.0009765625, %v889_v43 }
 0x186   : > { %v838_v38 = vpop.xlane.xlu2 %837 }
 0x187   : > { %v842_v39 = vadd.f32 %v838_v38, %v802_v37 }
 0x189   : > { %847 = vst.msk [vmem:[#allocation3 + $0x18] sm:$0xff] %vm341_vm1, %v842_v39 }
 0x18e   : > { %v829_v45 = vpop.xlane.xlu2 %828 }
 0x18f   : > { %v841_v40 = vadd.f32 %v829_v45, %v801_v41 }
 0x190   : > { %v891_v48 = vld [vmem:[#allocation3 + $0x18] sm:$0xff] }
 0x191   : > { %846 = vst.msk [vmem:[#allocation3 + $0x10] sm:$0xff] %vm341_vm1, %v841_v40  ;;  %v895_v49 = vmul.f32 0.0009765625, %v891_v48 }
 0x193   : > { %929 = vmatpush.msra.mxu0 %v895_v49  ;;  %1346 = vmatpush.msra.mxu2 %v895_v49 }
 0x198   : > { %v890_v61 = vld [vmem:[#allocation3 + $0x10] sm:$0xff] }
 0x199   : > { %v894_v44 = vmul.f32 0.0009765625, %v890_v61 }
 0x19b   : > { %930 = vmatpush.msra.mxu0 %v894_v44  ;;  %1347 = vmatpush.msra.mxu2 %v894_v44 }
 0x19d   : > { %931 = vmatpush.msra.mxu0 %v893_v57  ;;  %1348 = vmatpush.msra.mxu2 %v893_v57 }
 0x19f   : > { %932 = vmatpush.msra.mxu0 %v892_v58  ;;  %1349 = vmatpush.msra.mxu2 %v892_v58 }
 0x1a0   : > { %1324 = vmatmul.msk.f32.vlgmr.msra.gmra.mxu0 %vm904_vm2, %v896_v59  ;;  %1327 = vmatmul.msk.f32.vlgmr.msra.gmra.mxu2 %vm904_vm2, %v899_v60 }
 0x1a8   : > { %1325 = vmatmul.msk.f32.gmra.mxu0 %vm904_vm2, %v897_v63 }
 0x1b0   : > { %1326 = vmatmul.msk.f32.gmra.mxu0 %vm904_vm2, %v898_v1 }
 0x21d   : > { %v934_v2 = vpop.f32.mrf.mxu0 }
 0x21e   : > { %v935_v6 = vadd.f32 %v934_v2, %v900_v51 }
 0x220   : > { %v1328_v42 = vmul.f32 -1.442695, %v935_v6 }
 0x222   : > { %1426 = vpow2.f32 %v1328_v42 }
 0x223   : > { %v943_v11 = vpop.f32.mrf.mxu2 }
 0x224   : > { %v944_v20 = vadd.f32 %v943_v11, %v903_v50 }
 0x225   : > { %v937_v14 = vpop.f32.mrf.mxu0 }
 0x226   : > { %v938_v18 = vadd.f32 %v937_v14, %v901_v7  ;;  %v1331_v26 = vmul.f32 -1.442695, %v944_v20 }
 0x228   : > { %v1427_v29 = vpop.eup %1426  ;;  %v1329_v30 = vmul.f32 -1.442695, %v938_v18  ;;  %1428 = vpow2.f32 %v1331_v26 }
 0x229   : > { %v958_v22 = vadd.f32 1.0, %v1427_v29 }
 0x22a   : > { %1430 = vpow2.f32 %v1329_v30 }
 0x22b   : > { %1432 = vrcp.f32 %v958_v22  ;;  %v973_v31 = vand.u32 2147483648, %v958_v22  ;;  %v971_v53 = vand.u32 2147483647, %v958_v22  ;;  %vm967_vm4 = vweird.f32 %v958_v22 }
 0x22d   : > { %v940_v10 = vpop.f32.mrf.mxu0  ;;  %v974_v39 = vor.u32 1.1754944e-38, %v973_v31  ;;  %vm972_vm6 = vcmp.eq.f32.partialorder %v971_v53, 8.507059e+37  ;;  %v1049_v31 = vunpack.c.h.bf16 %v2006_v47  ;;  %v1047_v53 = vunpack.c.h.bf16 %v2014_v25 }
 0x22e   : > { %v1429_v21 = vpop.eup %1428  ;;  %v941_v23 = vadd.f32 %v940_v10, %v902_v28 }
 0x22f   : > { %v2083_v13 = vadd.f32 1.0, %v1429_v21 }
 0x230   : > { %v1431_v46 = vpop.eup %1430  ;;  %v1330_v34 = vmul.f32 -1.442695, %v941_v23 }
 0x231   : > { %v1433_v62 = vpop.eup %1432  ;;  %v959_v8 = vadd.f32 1.0, %v1431_v46  ;;  %vm1012_vm13 = vweird.f32 %v2083_v13  ;;  %v1018_v26 = vand.u32 2147483648, %v2083_v13 }
 0x232   : > { %1434 = vpow2.f32 %v1330_v34  ;;  %v963_v35 = vmul.f32 %v1433_v62, %v958_v22  ;;  %vm968_vm3 = vweird.f32 %v1433_v62  ;;  %v1016_v22 = vand.u32 2147483647, %v2083_v13 }
 0x233   : > { %1436 = vrcp.f32 %v959_v8  ;;  %vm969_vm5 = vmor %vm967_vm4, %vm968_vm3  ;;  %v988_v43 = vand.u32 2147483648, %v959_v8  ;;  %v986_v19 = vand.u32 2147483647, %v959_v8  ;;  %vm982_vm8 = vweird.f32 %v959_v8 }
 0x234   : > { %v964_v27 = vsub.f32 1.0, %v963_v35  ;;  %1438 = vrcp.f32 %v2083_v13  ;;  %v1019_v21 = vor.u32 1.1754944e-38, %v1018_v26  ;;  %vm1017_vm2 = vcmp.eq.f32.partialorder %v1016_v22, 8.507059e+37 }
 0x235   : > { %v989_v60 = vor.u32 1.1754944e-38, %v988_v43  ;;  %vm987_vm10 = vcmp.eq.f32.partialorder %v986_v19, 8.507059e+37  ;;  %v1044_v35 = vunpack.c.l.bf16 %v1934_v54  ;;  %v1050_v43 = vunpack.c.l.bf16 %v1963_v16 }
 0x236   : > { %v965_v36 = vmul.f32 %v1433_v62, %v964_v27  ;;  %v1045_v27 = vunpack.c.h.bf16 %v1934_v54  ;;  %v1056_v19 = vunpack.c.l.bf16 %v2016_v52  ;;  %v1064_v26 = vunpack.c.l.bf16 %v2026_v56 }
 0x237   : > { %v1063_v22 = vunpack.c.h.bf16 %v2042_v9 }
 0x238   : > { %v1435_v12 = vpop.eup %1434  ;;  %v966_v15 = vadd.f32 %v1433_v62, %v965_v36  ;;  %v1046_v36 = vunpack.c.l.bf16 %v2014_v25  ;;  %v1053_v25 = vunpack.c.h.bf16 %v1950_v4 }
 0x239   : > { %v1437_v37 = vpop.eup %1436  ;;  %v960_v38 = vadd.f32 1.0, %v1435_v12 }
 0x23a   : > { %v970_v41 = vsel %vm969_vm5, %v1433_v62, %v966_v15  ;;  %v978_v45 = vmul.f32 %v1437_v37, %v959_v8  ;;  %v1439_v40 = vpop.eup %1438  ;;  %vm983_vm7 = vweird.f32 %v1437_v37  ;;  %v1042_v62 = vunpack.c.l.bf16 %v1946_v3 }
 0x23b   : > { %1440 = vrcp.f32 %v960_v38  ;;  %v975_v48 = vsel %vm972_vm6, %v974_v39, %v970_v41  ;;  %v1008_v57 = vmul.f32 %v1439_v40, %v2083_v13  ;;  %vm984_vm9 = vmor %vm982_vm8, %vm983_vm7  ;;  %v1003_v50 = vand.u32 2147483648, %v960_v38 }
 0x23c   : > { %v1022_v49 = vadd.f32 1.0, %v975_v48  ;;  %v979_v61 = vsub.f32 1.0, %v978_v45  ;;  %v1001_v11 = vand.u32 2147483647, %v960_v38  ;;  %vm997_vm12 = vweird.f32 %v960_v38 }
 0x23d   : > { %v1009_v51 = vsub.f32 1.0, %v1008_v57  ;;  %vm1013_vm14 = vweird.f32 %v1439_v40  ;;  %v1004_v18 = vor.u32 1.1754944e-38, %v1003_v50  ;;  %v1043_v8 = vunpack.c.h.bf16 %v1946_v3 }
 0x23e   : > { %1076 = vperm.xlu2 %1425, %v1022_v49   ;;  %v980_v44 = vmul.f32 %v1437_v37, %v979_v61  ;;  %vm1002_vm0 = vcmp.eq.f32.partialorder %v1001_v11, 8.507059e+37  ;;  %vm1014_vm1 = vmor %vm1012_vm13, %vm1013_vm14  ;;  %v1048_v13 = vunpack.c.l.bf16 %v2006_v47  ;;  %v1052_v47 = vunpack.c.l.bf16 %v1950_v4 }
 0x23f   : > { %v1010_v20 = vmul.f32 %v1439_v40, %v1009_v51  ;;  %v1057_v57 = vunpack.c.h.bf16 %v2016_v52 }
 0x240   : > { %v981_v58 = vadd.f32 %v1437_v37, %v980_v44  ;;  %v1051_v44 = vunpack.c.h.bf16 %v1963_v16 }
 0x241   : > { %v1441_v59 = vpop.eup %1440  ;;  %v1011_v30 = vadd.f32 %v1439_v40, %v1010_v20  ;;  %v1061_v20 = vunpack.c.h.bf16 %v1969_v17 }
 0x242   : > { %v985_v63 = vsel %vm984_vm9, %v1437_v37, %v981_v58  ;;  %v993_v1 = vmul.f32 %v1441_v59, %v960_v38  ;;  %vm998_vm11 = vweird.f32 %v1441_v59  ;;  %v1054_v58 = vunpack.c.l.bf16 %v2024_v0 }
 0x243   : > { %v990_v2 = vsel %vm987_vm10, %v989_v60, %v985_v63  ;;  %vm999_vm15 = vmor %vm997_vm12, %vm998_vm11  ;;  %v1015_v23 = vsel %vm1014_vm1, %v1439_v40, %v1011_v30  ;;  %v1062_v30 = vunpack.c.l.bf16 %v2042_v9  ;;  %v1068_v9 = vunpack.c.l.bf16 %v1997_v33 }
 0x244   : > { %v1023_v6 = vadd.f32 1.0, %v990_v2  ;;  %v994_v42 = vsub.f32 1.0, %v993_v1  ;;  %v1020_v46 = vsel %vm1017_vm2, %v1019_v21, %v1015_v23 }
 0x245   : > { %v1025_v34 = vadd.f32 1.0, %v1020_v46 }
 0x246   : > { %1081 = vperm.xlu2 %1425, %v1023_v6   ;;  %v995_v7 = vmul.f32 %v1441_v59, %v994_v42 }
 0x248   : > { %v996_v14 = vadd.f32 %v1441_v59, %v995_v7 }
 0x24a   : > { %v1000_v29 = vsel %vm999_vm15, %v1441_v59, %v996_v14  ;;  %v1055_v59 = vunpack.c.h.bf16 %v2024_v0  ;;  %v1060_v0 = vunpack.c.l.bf16 %v1969_v17  ;;  %v1058_v14 = vunpack.c.l.bf16 %v1991_v32 }
 0x24b   : > { %v1005_v28 = vsel %vm1002_vm0, %v1004_v18, %v1000_v29  ;;  %v1059_v18 = vunpack.c.h.bf16 %v1991_v32  ;;  %v1065_v29 = vunpack.c.h.bf16 %v2026_v56 }
 0x24c   : > { %v1024_v10 = vadd.f32 1.0, %v1005_v28 }
 0x24e   : > { %1086 = vperm.xlu2 %1425, %v1024_v10  }
 0x256   : > { %1091 = vperm.xlu2 %1425, %v1025_v34  }
 0x298   : > { %v1077_v12 = vpop.permute.xlu2 %1076 }
 0x299   : > { %v1094_v15 = vmul.f32 %v1077_v12, %v1042_v62  ;;  %v1095_v37 = vmul.f32 %v1077_v12, %v1043_v8  ;;  %v1096_v38 = vmul.f32 %v1077_v12, %v1044_v35  ;;  %v1097_v39 = vmul.f32 %v1077_v12, %v1045_v27 }
 0x29a   : > { %v1098_v41 = vmul.f32 %v1077_v12, %v1046_v36  ;;  %v1099_v3 = vmul.f32 %v1077_v12, %v1047_v53  ;;  %v1100_v45 = vmul.f32 %v1077_v12, %v1048_v13  ;;  %v1101_v40 = vmul.f32 %v1077_v12, %v1049_v31 }
 0x29b   : > { %v1126_v48 = vpack.c.bf16 %v1095_v37, %v1094_v15  ;;  %v1127_v54 = vpack.c.bf16 %v1097_v39, %v1096_v38  ;;  %v1069_v13 = vunpack.c.h.bf16 %v1997_v33  ;;  %v1066_v31 = vunpack.c.l.bf16 %v2004_v55 }
 0x29c   : > { %v1128_v49 = vpack.c.bf16 %v1099_v3, %v1098_v41  ;;  %v1129_v61 = vpack.c.bf16 %v1101_v40, %v1100_v45  ;;  %v1067_v36 = vunpack.c.h.bf16 %v2004_v55  ;;  %v1072_v53 = vunpack.c.l.bf16 %v2044_v5 }
 0x29d   : > { %1142 = vst [vmem:[%s2099_s20] sm:$0xff] %v1126_v48  ;;  %v1073_v12 = vunpack.c.h.bf16 %v2044_v5  ;;  %v1070_v15 = vunpack.c.l.bf16 %v2053_v24  ;;  %v1071_v37 = vunpack.c.h.bf16 %v2053_v24 }
 0x29e   : > { %1143 = vst [vmem:[%s2099_s20 + $0x8] sm:$0xff] %v1127_v54 }
 0x29f   : > { %1144 = vst [vmem:[%s2099_s20 + $0x10] sm:$0xff] %v1128_v49 }
 0x2a0   : > { %1145 = vst [vmem:[%s2099_s20 + $0x18] sm:$0xff] %v1129_v61  ;;  %v1082_v60 = vpop.permute.xlu2 %1081 }
 0x2a1   : > { %v1102_v63 = vmul.f32 %v1082_v60, %v1050_v43  ;;  %v1103_v1 = vmul.f32 %v1082_v60, %v1051_v44  ;;  %v1104_v4 = vmul.f32 %v1082_v60, %v1052_v47  ;;  %v1105_v51 = vmul.f32 %v1082_v60, %v1053_v25 }
 0x2a2   : > { %v1106_v2 = vmul.f32 %v1082_v60, %v1054_v58  ;;  %v1107_v16 = vmul.f32 %v1082_v60, %v1055_v59  ;;  %v1108_v6 = vmul.f32 %v1082_v60, %v1056_v19  ;;  %v1109_v42 = vmul.f32 %v1082_v60, %v1057_v57 }
 0x2a3   : > { %v1130_v50 = vpack.c.bf16 %v1103_v1, %v1102_v63  ;;  %v1131_v52 = vpack.c.bf16 %v1105_v51, %v1104_v4 }
 0x2a4   : > { %v1132_v7 = vpack.c.bf16 %v1107_v16, %v1106_v2  ;;  %v1133_v11 = vpack.c.bf16 %v1109_v42, %v1108_v6 }
 0x2a5   : > { %1146 = vst [vmem:[%s2099_s20 + $0x20] sm:$0xff] %v1130_v50 }
 0x2a6   : > { %1147 = vst [vmem:[%s2099_s20 + $0x28] sm:$0xff] %v1131_v52 }
 0x2a7   : > { %1148 = vst [vmem:[%s2099_s20 + $0x30] sm:$0xff] %v1132_v7 }
 0x2a8   : > { %1149 = vst [vmem:[%s2099_s20 + $0x38] sm:$0xff] %v1133_v11  ;;  %v1087_v28 = vpop.permute.xlu2 %1086 }
 0x2a9   : > { %v1110_v10 = vmul.f32 %v1087_v28, %v1058_v14  ;;  %v1111_v17 = vmul.f32 %v1087_v28, %v1059_v18  ;;  %v1112_v21 = vmul.f32 %v1087_v28, %v1060_v0  ;;  %v1113_v23 = vmul.f32 %v1087_v28, %v1061_v20 }
 0x2aa   : > { %v1114_v32 = vmul.f32 %v1087_v28, %v1062_v30  ;;  %v1115_v46 = vmul.f32 %v1087_v28, %v1063_v22  ;;  %v1116_v34 = vmul.f32 %v1087_v28, %v1064_v26  ;;  %v1117_v62 = vmul.f32 %v1087_v28, %v1065_v29 }
 0x2ab   : > { %v1134_v8 = vpack.c.bf16 %v1111_v17, %v1110_v10  ;;  %v1135_v56 = vpack.c.bf16 %v1113_v23, %v1112_v21 }
 0x2ac   : > { %v1136_v35 = vpack.c.bf16 %v1115_v46, %v1114_v32  ;;  %v1137_v27 = vpack.c.bf16 %v1117_v62, %v1116_v34 }
 0x2ad   : > { %1150 = vst [vmem:[%s2099_s20 + $0x40] sm:$0xff] %v1134_v8 }
 0x2ae   : > { %1151 = vst [vmem:[%s2099_s20 + $0x48] sm:$0xff] %v1135_v56 }
 0x2af   : > { %1152 = vst [vmem:[%s2099_s20 + $0x50] sm:$0xff] %v1136_v35 }
 0x2b0   : > { %1153 = vst [vmem:[%s2099_s20 + $0x58] sm:$0xff] %v1137_v27  ;;  %v1092_v33 = vpop.permute.xlu2 %1091 }
 0x2b1   : > { %v1118_v38 = vmul.f32 %v1092_v33, %v1066_v31  ;;  %v1119_v39 = vmul.f32 %v1092_v33, %v1067_v36  ;;  %v1120_v55 = vmul.f32 %v1092_v33, %v1068_v9  ;;  %v1121_v41 = vmul.f32 %v1092_v33, %v1069_v13 }
 0x2b2   : > { %v1122_v3 = vmul.f32 %v1092_v33, %v1070_v15  ;;  %v1123_v45 = vmul.f32 %v1092_v33, %v1071_v37  ;;  %v1124_v40 = vmul.f32 %v1092_v33, %v1072_v53  ;;  %v1125_v48 = vmul.f32 %v1092_v33, %v1073_v12 }
 0x2b3   : > { %v1138_v5 = vpack.c.bf16 %v1119_v39, %v1118_v38  ;;  %v1139_v24 = vpack.c.bf16 %v1121_v41, %v1120_v55 }
 0x2b4   : > { %v1140_v54 = vpack.c.bf16 %v1123_v45, %v1122_v3  ;;  %v1141_v49 = vpack.c.bf16 %v1125_v48, %v1124_v40 }
 0x2b5   : > { %1154 = vst [vmem:[%s2099_s20 + $0x60] sm:$0xff] %v1138_v5 }
 0x2b6   : > { %1155 = vst [vmem:[%s2099_s20 + $0x68] sm:$0xff] %v1139_v24 }
 0x2b7   : > { %1156 = vst [vmem:[%s2099_s20 + $0x70] sm:$0xff] %v1140_v54 }
 0x2b8   : > { %1157 = vst [vmem:[%s2099_s20 + $0x78] sm:$0xff] %v1141_v49 }
 0x2b9   : > { %1529 = shalt.err (!%p1526_p13)
}
 0x2ba   : > { %s1594_s11 = smov 512   ;;  %s1595_s18 = smov 32  }
 0x2bb   : > { %1354 = dma.vmem_to_hbm [thread:$0]  (%p1682_p9), %s1172_s24, 2048, %s1174_s25, %s1159_s29, %s1594_s11, %s1594_s11, %s1595_s18  }
 0x2bc PF: > { %s1188_s19 = sand.u32 1, %s1568_s21   ;;  %p1364_p0 = pnand %p1289_p12, %p1689_p11 }
 0x2bd   : > { %s1189_s7 = scalar_lea.sflag [#allocation6], %s1188_s19 }
 0x2be   : > { %p1365_p1 = pneg %p1364_p0 }
 0x2c0   : > { %1563 = dma.done.wait (%p1365_p1), %s1189_s7, 2048  }
 0x2c1   : > { %1565 = vsyncadd (%p1365_p1), %s1189_s7, 4294965248  ;;  %s25_s26 = sadd.s32 1, %s1588_s26   ;;  %s2199_s20 = sld [smem:[#allocation15_spill]] }
 0x2c2   : > { %p22_p2 = scmp.ge.s32.totalorder %s25_s26, 4   ;;  %s2200_s24 = sld [smem:[#allocation13_spill]] }
 0x2c3   : > { %s2201_s25 = sld [smem:[#allocation14_spill]]  ;;  %s2202_s21 = smov %s1572_s22 }
 0x2c4   : > { %s2203_s22 = smov %s1576_s23  ;;  %24 = sbr.rel (!%p22_p2) target bundleno = 10 (0xa), region = 111 }
 0x2c7   : > { %s2204_s23 = smov %s2199_s20 }
 0x2c9   :  { %1195 = vsyncpa [#allocation5], 1 }
 0x2ca   :  { %1197 = vsyncpa [#allocation5 + $0x1], 1 }
 0x2cb   :  { %1198 = vsyncpa [#allocation8], 1 }
 0x2cc   :  { %1200 = vsyncpa [#allocation8 + $0x1], 1 }
 0x2cd   :  { %1201 = vsyncpa [#allocation6], 1 }
 0x2ce   :  { %1203 = vsyncpa [#allocation6 + $0x1], 1 }

</bundles_post_ra>
